<compile_context>
chip_gen: v7x
topology: tpu7x:2x2x1
jax: 0.10.0
libtpu: 0.0.40
codegen_flags: <defaults>
</compile_context>

<pallas_src>
import math

import jax
import jax.numpy as jnp
import numpy as np
from jax.experimental import pallas as pl
from jax.experimental.pallas import tpu as pltpu

NEG_SLOPE = 0.01            # torch.nn.LeakyReLU() default
POS_DIM = 128
HALF_DIM = POS_DIM // 2     # 64
T_ENC_DIM = POS_DIM * 2     # 256
ENC_LAYERS = [256, 256]
DEC_LAYERS = [256, 256]
X_DIM = 1

# layout of the packed (10, 256, 256) bf16 weight stack
W_TW1, W_TW2, W_XW1, W_XW2, W_EW1, W_EW2, W_NW0X, W_NW0T, W_NW0E, W_NW1 = range(10)
# layout of the packed (11, 256) f32 bias stack
B_TB0, B_TB1, B_TB2, B_XB0, B_XB1, B_XB2, B_EB0, B_EB1, B_EB2, B_NB0, B_NB1 = range(11)
# layout of the packed (4, 256) f32 rank-1 rows: x_enc W0, e_enc W0, selfcond col, final W2
R_XW0, R_EW0, R_NW0S, R_NW2 = range(4)


def _leaky(v):
    return jnp.where(v >= 0, v, NEG_SLOPE * v)


def _round_up(n, m):
    return ((n + m - 1) // m) * m


# ----------------------------------------------------------------------------
# fused kernel
# ----------------------------------------------------------------------------
def score_network_kernel(scal_ref, fp_ref, tw0_ref, w_ref, b_ref, r_ref,
                         nb2_ref, out_ref):
    scal = scal_ref[...]                       # (TB, 4) f32: [t, x, selfcond, cond]
    t = scal[:, 0:1]
    x = scal[:, 1:2]
    sc = scal[:, 2:3]
    cond = scal[:, 3:4]

    fp = fp_ref[...]                           # (2, 128) f32: [freq row; phase row]
    freq = fp[0:1, :]
    phase = fp[1:2, :]
    biases = b_ref[...]                        # (11, 256) f32
    rows = r_ref[...]                          # (4, 256) f32

    def w(k):
        return w_ref[k]                        # (256, 256) bf16, VMEM-resident

    def bias(k):
        return biases[k:k + 1, :]              # (1, 256)

    def row(k):
        return rows[k:k + 1, :]                # (1, 256)

    def dot(a, wk):
        # explicit bf16 MXU operands, f32 accumulation
        return jnp.dot(a.astype(jnp.bfloat16), wk,
                       preferred_element_type=jnp.float32)

    # --- sinusoidal timestep embedding as a single phase-shifted sin:
    #     lanes [0,64) phase=0 -> sin, lanes [64,128) phase=pi/2 -> cos ---
    emb = jnp.sin(t * freq + phase)                            # (TB, 128) f32

    # --- t_encoder: 128 -> 256 -> 256 -> 256 ---
    h = _leaky(dot(emb, tw0_ref[...]) + bias(B_TB0))
    h = _leaky(dot(h, w(W_TW1)) + bias(B_TB1))
    temb = dot(h, w(W_TW2)) + bias(B_TB2)

    # --- x_encoder: 1 -> 256 -> 256 -> 256 (first layer is a rank-1 VPU broadcast) ---
    h = _leaky(x * row(R_XW0) + bias(B_XB0))
    h = _leaky(dot(h, w(W_XW1)) + bias(B_XB1))
    xemb = dot(h, w(W_XW2)) + bias(B_XB2)

    # --- e_encoder on cond: 1 -> 256 -> 256 -> 256 ---
    h = _leaky(cond * row(R_EW0) + bias(B_EB0))
    h = _leaky(dot(h, w(W_EW1)) + bias(B_EB1))
    eemb = dot(h, w(W_EW2)) + bias(B_EB2)

    # --- decoder on concat([xemb, temb, selfcond, eemb]) : 769 -> 256 -> 256 -> 1 ---
    h = (dot(xemb, w(W_NW0X)) + dot(temb, w(W_NW0T)) + dot(eemb, w(W_NW0E))
         + sc * row(R_NW0S) + bias(B_NB0))
    h = _leaky(h)
    h = _leaky(dot(h, w(W_NW1)) + bias(B_NB1))
    # final 256 -> 1 as VPU mul + cross-lane (XLU) reduction
    out_ref[...] = jnp.sum(h * row(R_NW2), axis=-1, keepdims=True) + nb2_ref[...]


# ----------------------------------------------------------------------------
# parameter construction (deterministic, PyTorch-Linear-style uniform init)
# ----------------------------------------------------------------------------
def _linear_params(key, fan_in, fan_out):
    kw, kb = jax.random.split(key)
    bound = 1.0 / math.sqrt(fan_in)
    w = jax.random.uniform(kw, (fan_in, fan_out), jnp.float32, -bound, bound)
    b = jax.random.uniform(kb, (1, fan_out), jnp.float32, -bound, bound)
    return w, b


def _mlp_params(key, input_dim, widths):
    keys = jax.random.split(key, len(widths))
    params = []
    prev = input_dim
    for k, w in zip(keys, widths):
        params.append(_linear_params(k, prev, w))
        prev = w
    return params


def make_params(seed=0):
    key = jax.random.PRNGKey(seed)
    k_t, k_x, k_e, k_n = jax.random.split(key, 4)
    t_enc = _mlp_params(k_t, POS_DIM, ENC_LAYERS + [T_ENC_DIM])
    x_enc = _mlp_params(k_x, X_DIM, ENC_LAYERS + [T_ENC_DIM])
    e_enc = _mlp_params(k_e, 1, ENC_LAYERS + [T_ENC_DIM])
    net = _mlp_params(k_n, 3 * T_ENC_DIM + 1, DEC_LAYERS + [X_DIM])
    return {"t_enc": t_enc, "x_enc": x_enc, "e_enc": e_enc, "net": net}


def pack_params(params):
    """Pack weights ONCE into the kernel's operand layout (no per-call repack)."""
    (tW0, tb0), (tW1, tb1), (tW2, tb2) = params["t_enc"]
    (xW0, xb0), (xW1, xb1), (xW2, xb2) = params["x_enc"]
    (eW0, eb0), (eW1, eb1), (eW2, eb2) = params["e_enc"]
    (nW0, nb0), (nW1, nb1), (nW2, nb2) = params["net"]

    # split decoder first layer over the concat [xemb(256), temb(256), sc(1), eemb(256)]
    nW0x = nW0[0:T_ENC_DIM]
    nW0t = nW0[T_ENC_DIM:2 * T_ENC_DIM]
    nW0s = nW0[2 * T_ENC_DIM:2 * T_ENC_DIM + 1]
    nW0e = nW0[2 * T_ENC_DIM + 1:]

    W10 = jnp.stack([tW1, tW2, xW1, xW2, eW1, eW2,
                     nW0x, nW0t, nW0e, nW1]).astype(jnp.bfloat16)        # (10,256,256)
    B11 = jnp.concatenate([tb0, tb1, tb2, xb0, xb1, xb2,
                           eb0, eb1, eb2, nb0, nb1], axis=0)             # (11,256) f32
    R4 = jnp.concatenate([xW0, eW0, nW0s, nW2.T], axis=0)                # (4,256) f32

    # sinusoidal embedding constants: row0 = freq (tiled x2), row1 = phase (0 / pi/2)
    scale = math.log(10000.0) / (HALF_DIM - 1)
    freq = jnp.exp(jnp.arange(HALF_DIM, dtype=jnp.float32) * -scale)
    freq2 = jnp.concatenate([freq, freq])
    phase = jnp.concatenate([jnp.zeros((HALF_DIM,), jnp.float32),
                             jnp.full((HALF_DIM,), math.pi / 2, jnp.float32)])
    freq_phase = jnp.stack([freq2, phase])                               # (2,128) f32

    packed = {
        "tW0": tW0.astype(jnp.bfloat16),      # (128, 256) bf16
        "W10": W10,
        "B11": B11,
        "R4": R4,
        "nb2": nb2.astype(jnp.float32),       # (1, 1)
        "freq_phase": freq_phase,
    }
    return jax.tree_util.tree_map(jnp.asarray, packed)


# ----------------------------------------------------------------------------
# batch-tile selection (per TPU generation)
# ----------------------------------------------------------------------------
def _tile_config(B):
    try:
        kind = jax.devices()[0].device_kind.lower()
    except Exception:
        kind = ""
    if "v7" in kind:
        tb_cap = 2048            # v7x: 64 MiB VMEM -> keep f32 activations well inside budget
        vmem_cap = 48 << 20
    else:
        tb_cap = 4096            # v5e / v6e: 128 MiB VMEM
        vmem_cap = 96 << 20

    if B <= 256:
        TB = _round_up(max(B, 1), 8)
        B_pad = TB
    else:
        # >= 2 grid steps (megacore on v7x), TB a multiple of 256, capped per chip
        TB = min(tb_cap, _round_up((B + 1) // 2, 256))
        B_pad = _round_up(B, TB)

    # scoped VMEM: ~12 KiB/row live f32 activations + weights/pipeline margin
    vmem_limit = min(vmem_cap, (32 << 20) + TB * 12 * 1024)
    return TB, B_pad, vmem_limit


# ----------------------------------------------------------------------------
# wrapper
# ----------------------------------------------------------------------------
def score_network_forward(packed, x, t, cond, selfcond):
    """x:(B,1) t:(B,1) cond:(B,1) selfcond:(B,1) -> (B,1)"""
    B = x.shape[0]
    scal = jnp.concatenate([t, x, selfcond, cond], axis=-1).astype(jnp.float32)  # (B,4)

    TB, B_pad, vmem_limit = _tile_config(B)
    if B_pad != B:
        scal = jnp.pad(scal, ((0, B_pad - B), (0, 0)))
    grid = (B_pad // TB,)

    out = pl.pallas_call(
        score_network_kernel,
        out_shape=jax.ShapeDtypeStruct((B_pad, X_DIM), jnp.float32),
        grid=grid,
        in_specs=[
            pl.BlockSpec((TB, 4), lambda i: (i, 0)),                        # packed scalars
            pl.BlockSpec((2, POS_DIM), lambda i: (0, 0)),                   # freq / phase
            pl.BlockSpec((POS_DIM, T_ENC_DIM), lambda i: (0, 0)),           # t_enc W0 (bf16)
            pl.BlockSpec((10, T_ENC_DIM, T_ENC_DIM), lambda i: (0, 0, 0)),  # 256x256 stack (bf16)
            pl.BlockSpec((11, T_ENC_DIM), lambda i: (0, 0)),                # bias stack
            pl.BlockSpec((4, T_ENC_DIM), lambda i: (0, 0)),                 # rank-1 rows
            pl.BlockSpec((1, 1), lambda i: (0, 0)),                         # final bias
        ],
        out_specs=pl.BlockSpec((TB, X_DIM), lambda i: (i, 0)),
        compiler_params=pltpu.CompilerParams(
            dimension_semantics=("parallel",),
            vmem_limit_bytes=vmem_limit,
        ),
    )(scal, packed["freq_phase"], packed["tW0"], packed["W10"],
      packed["B11"], packed["R4"], packed["nb2"])
    return out[:B]


# ----------------------------------------------------------------------------
# pure-JAX reference (mirrors the PyTorch forward) for a sanity check
# ----------------------------------------------------------------------------
def _mlp_ref(inp, layers):
    h = inp
    for (w, b) in layers[:-1]:
        h = _leaky(h @ w + b)
    w, b = layers[-1]
    return h @ w + b


def score_network_ref(params, x, t, cond, selfcond):
    scale = math.log(10000.0) / (HALF_DIM - 1)
    freq = jnp.exp(jnp.arange(HALF_DIM, dtype=jnp.float32) * -scale)[None, :]
    ang = t * freq
    temb = jnp.concatenate([jnp.sin(ang), jnp.cos(ang)], axis=-1)
    temb = _mlp_ref(temb, params["t_enc"])
    xemb = _mlp_ref(x, params["x_enc"])
    eemb = _mlp_ref(cond, params["e_enc"])
    h = jnp.concatenate([xemb, temb, selfcond, eemb], axis=-1)
    return _mlp_ref(h, params["net"])


if __name__ == "__main__":
    params = make_params(seed=0)
    packed = pack_params(params)      # pack once; forward never repacks
    fwd = jax.jit(score_network_forward)

    def make_inputs(B, seed):
        key = jax.random.PRNGKey(seed)
        kx, kt, kc, ks = jax.random.split(key, 4)
        x = jax.random.normal(kx, (B, X_DIM), jnp.float32)
        t = jax.random.uniform(kt, (B, 1), jnp.float32) * 100.0   # timestep values
        cond = jax.random.normal(kc, (B, 1), jnp.float32)
        selfcond = jax.random.normal(ks, (B, 1), jnp.float32)
        return x, t, cond, selfcond

    # small single-tile check (B=8)
    x, t, cond, selfcond = make_inputs(8, 0)
    out = jax.block_until_ready(fwd(packed, x, t, cond, selfcond))
    ref = score_network_ref(params, x, t, cond, selfcond)
    np.testing.assert_allclose(np.asarray(out), np.asarray(ref), rtol=2e-2, atol=2e-2)

    # larger check exercising the batch grid (B=300 -> pad to 512, two 256-row tiles)
    x, t, cond, selfcond = make_inputs(300, 1)
    out = jax.block_until_ready(fwd(params := params and packed, x, t, cond, selfcond)) \
        if False else jax.block_until_ready(fwd(packed, x, t, cond, selfcond))
    ref = score_network_ref(make_params(seed=0), x, t, cond, selfcond)
    np.testing.assert_allclose(np.asarray(out), np.asarray(ref), rtol=2e-2, atol=2e-2)

    print("KERNEL_OK")
</pallas_src>

<mosaic_0001>
module attributes {stable_mosaic.version = 11 : i64} {
  func.func @score_network_kernel(%arg0: i32, %arg1: memref<8x4xf32, #tpu.memory_space<vmem>>, %arg2: memref<2x128xf32, #tpu.memory_space<vmem>>, %arg3: memref<128x256xbf16, #tpu.memory_space<vmem>>, %arg4: memref<10x256x256xbf16, #tpu.memory_space<vmem>>, %arg5: memref<11x256xf32, #tpu.memory_space<vmem>>, %arg6: memref<4x256xf32, #tpu.memory_space<vmem>>, %arg7: memref<1x1xf32, #tpu.memory_space<vmem>>, %arg8: memref<8x1xf32, #tpu.memory_space<vmem>>) attributes {dimension_semantics = [#tpu.dimension_semantics<parallel>], iteration_bounds = array<i64: 1>, scalar_prefetch = 0 : i64, scratch_operands = 0 : i64, tpu.core_type = #tpu.core_type<tc>, window_params = [{transform_indices = @transform_0, window_bounds = array<i64: 8, 4>}, {pipeline_mode = #tpu.pipeline_mode<synchronous>, transform_indices = @transform_1, window_bounds = array<i64: 2, 128>}, {pipeline_mode = #tpu.pipeline_mode<synchronous>, transform_indices = @transform_2, window_bounds = array<i64: 128, 256>}, {pipeline_mode = #tpu.pipeline_mode<synchronous>, transform_indices = @transform_3, window_bounds = array<i64: 10, 256, 256>}, {pipeline_mode = #tpu.pipeline_mode<synchronous>, transform_indices = @transform_4, window_bounds = array<i64: 11, 256>}, {pipeline_mode = #tpu.pipeline_mode<synchronous>, transform_indices = @transform_5, window_bounds = array<i64: 4, 256>}, {pipeline_mode = #tpu.pipeline_mode<synchronous>, transform_indices = @transform_6, window_bounds = array<i64: 1, 1>}, {transform_indices = @transform_7, window_bounds = array<i64: 8, 1>}]} {
    %c0 = arith.constant 0 : index
    %c0_0 = arith.constant 0 : index
    %0 = vector.load %arg1[%c0, %c0_0] : memref<8x4xf32, #tpu.memory_space<vmem>>, vector<8x4xf32>
    %1 = vector.extract_strided_slice %0 {offsets = [0, 0], sizes = [8, 1], strides = [1, 1]} : vector<8x4xf32> to vector<8x1xf32>
    %2 = vector.extract_strided_slice %0 {offsets = [0, 1], sizes = [8, 1], strides = [1, 1]} : vector<8x4xf32> to vector<8x1xf32>
    %3 = vector.extract_strided_slice %0 {offsets = [0, 2], sizes = [8, 1], strides = [1, 1]} : vector<8x4xf32> to vector<8x1xf32>
    %4 = vector.extract_strided_slice %0 {offsets = [0, 3], sizes = [8, 1], strides = [1, 1]} : vector<8x4xf32> to vector<8x1xf32>
    %c0_1 = arith.constant 0 : index
    %c0_2 = arith.constant 0 : index
    %5 = vector.load %arg2[%c0_1, %c0_2] : memref<2x128xf32, #tpu.memory_space<vmem>>, vector<2x128xf32>
    %6 = vector.extract_strided_slice %5 {offsets = [0, 0], sizes = [1, 128], strides = [1, 1]} : vector<2x128xf32> to vector<1x128xf32>
    %7 = vector.extract_strided_slice %5 {offsets = [1, 0], sizes = [1, 128], strides = [1, 1]} : vector<2x128xf32> to vector<1x128xf32>
    %c0_3 = arith.constant 0 : index
    %c0_4 = arith.constant 0 : index
    %8 = vector.load %arg5[%c0_3, %c0_4] : memref<11x256xf32, #tpu.memory_space<vmem>>, vector<11x256xf32>
    %c0_5 = arith.constant 0 : index
    %c0_6 = arith.constant 0 : index
    %9 = vector.load %arg6[%c0_5, %c0_6] : memref<4x256xf32, #tpu.memory_space<vmem>>, vector<4x256xf32>
    %10 = vector.broadcast %1 : vector<8x1xf32> to vector<8x128xf32>
    %11 = vector.broadcast %6 : vector<1x128xf32> to vector<8x128xf32>
    %12 = arith.mulf %10, %11 : vector<8x128xf32>
    %13 = vector.broadcast %7 : vector<1x128xf32> to vector<8x128xf32>
    %14 = arith.addf %12, %13 : vector<8x128xf32>
    %15 = math.sin %14 : vector<8x128xf32>
    %c0_7 = arith.constant 0 : index
    %c0_8 = arith.constant 0 : index
    %16 = vector.load %arg3[%c0_7, %c0_8] : memref<128x256xbf16, #tpu.memory_space<vmem>>, vector<128x256xbf16>
    %17 = arith.truncf %15 : vector<8x128xf32> to vector<8x128xbf16>
    %cst = arith.constant dense<0.000000e+00> : vector<8x256xf32>
    %18 = tpu.matmul %17, %16, %cst {dimension_numbers = #tpu.dot_dimension_numbers<[1], [0], [0], [1], [0, 0, 1, 1], [], []>} : vector<8x128xbf16>, vector<128x256xbf16>, vector<8x256xf32> -> vector<8x256xf32>
    %19 = vector.extract_strided_slice %8 {offsets = [0, 0], sizes = [1, 256], strides = [1, 1]} : vector<11x256xf32> to vector<1x256xf32>
    %20 = vector.broadcast %19 : vector<1x256xf32> to vector<8x256xf32>
    %21 = arith.addf %18, %20 : vector<8x256xf32>
    %cst_9 = arith.constant 0.000000e+00 : f32
    %22 = vector.broadcast %cst_9 : f32 to vector<8x256xf32>
    %23 = arith.cmpf oge, %21, %22 : vector<8x256xf32>
    %cst_10 = arith.constant 0.00999999977 : f32
    %24 = vector.broadcast %cst_10 : f32 to vector<8x256xf32>
    %25 = arith.mulf %24, %21 : vector<8x256xf32>
    %26 = arith.select %23, %21, %25 : vector<8x256xi1>, vector<8x256xf32>
    %c0_11 = arith.constant 0 : index
    %c0_12 = arith.constant 0 : index
    %c0_13 = arith.constant 0 : index
    %27 = vector.load %arg4[%c0_11, %c0_12, %c0_13] : memref<10x256x256xbf16, #tpu.memory_space<vmem>>, vector<1x256x256xbf16>
    %28 = vector.shape_cast %27 : vector<1x256x256xbf16> to vector<256x256xbf16>
    %29 = arith.truncf %26 : vector<8x256xf32> to vector<8x256xbf16>
    %cst_14 = arith.constant dense<0.000000e+00> : vector<8x256xf32>
    %30 = tpu.matmul %29, %28, %cst_14 {dimension_numbers = #tpu.dot_dimension_numbers<[1], [0], [0], [1], [0, 0, 1, 1], [], []>} : vector<8x256xbf16>, vector<256x256xbf16>, vector<8x256xf32> -> vector<8x256xf32>
    %31 = vector.extract_strided_slice %8 {offsets = [1, 0], sizes = [1, 256], strides = [1, 1]} : vector<11x256xf32> to vector<1x256xf32>
    %32 = vector.broadcast %31 : vector<1x256xf32> to vector<8x256xf32>
    %33 = arith.addf %30, %32 : vector<8x256xf32>
    %cst_15 = arith.constant 0.000000e+00 : f32
    %34 = vector.broadcast %cst_15 : f32 to vector<8x256xf32>
    %35 = arith.cmpf oge, %33, %34 : vector<8x256xf32>
    %cst_16 = arith.constant 0.00999999977 : f32
    %36 = vector.broadcast %cst_16 : f32 to vector<8x256xf32>
    %37 = arith.mulf %36, %33 : vector<8x256xf32>
    %38 = arith.select %35, %33, %37 : vector<8x256xi1>, vector<8x256xf32>
    %c1 = arith.constant 1 : index
    %c0_17 = arith.constant 0 : index
    %c0_18 = arith.constant 0 : index
    %39 = vector.load %arg4[%c1, %c0_17, %c0_18] : memref<10x256x256xbf16, #tpu.memory_space<vmem>>, vector<1x256x256xbf16>
    %40 = vector.shape_cast %39 : vector<1x256x256xbf16> to vector<256x256xbf16>
    %41 = arith.truncf %38 : vector<8x256xf32> to vector<8x256xbf16>
    %cst_19 = arith.constant dense<0.000000e+00> : vector<8x256xf32>
    %42 = tpu.matmul %41, %40, %cst_19 {dimension_numbers = #tpu.dot_dimension_numbers<[1], [0], [0], [1], [0, 0, 1, 1], [], []>} : vector<8x256xbf16>, vector<256x256xbf16>, vector<8x256xf32> -> vector<8x256xf32>
    %43 = vector.extract_strided_slice %8 {offsets = [2, 0], sizes = [1, 256], strides = [1, 1]} : vector<11x256xf32> to vector<1x256xf32>
    %44 = vector.broadcast %43 : vector<1x256xf32> to vector<8x256xf32>
    %45 = arith.addf %42, %44 : vector<8x256xf32>
    %46 = vector.extract_strided_slice %9 {offsets = [0, 0], sizes = [1, 256], strides = [1, 1]} : vector<4x256xf32> to vector<1x256xf32>
    %47 = vector.broadcast %2 : vector<8x1xf32> to vector<8x256xf32>
    %48 = vector.broadcast %46 : vector<1x256xf32> to vector<8x256xf32>
    %49 = arith.mulf %47, %48 : vector<8x256xf32>
    %50 = vector.extract_strided_slice %8 {offsets = [3, 0], sizes = [1, 256], strides = [1, 1]} : vector<11x256xf32> to vector<1x256xf32>
    %51 = vector.broadcast %50 : vector<1x256xf32> to vector<8x256xf32>
    %52 = arith.addf %49, %51 : vector<8x256xf32>
    %cst_20 = arith.constant 0.000000e+00 : f32
    %53 = vector.broadcast %cst_20 : f32 to vector<8x256xf32>
    %54 = arith.cmpf oge, %52, %53 : vector<8x256xf32>
    %cst_21 = arith.constant 0.00999999977 : f32
    %55 = vector.broadcast %cst_21 : f32 to vector<8x256xf32>
    %56 = arith.mulf %55, %52 : vector<8x256xf32>
    %57 = arith.select %54, %52, %56 : vector<8x256xi1>, vector<8x256xf32>
    %c2 = arith.constant 2 : index
    %c0_22 = arith.constant 0 : index
    %c0_23 = arith.constant 0 : index
    %58 = vector.load %arg4[%c2, %c0_22, %c0_23] : memref<10x256x256xbf16, #tpu.memory_space<vmem>>, vector<1x256x256xbf16>
    %59 = vector.shape_cast %58 : vector<1x256x256xbf16> to vector<256x256xbf16>
    %60 = arith.truncf %57 : vector<8x256xf32> to vector<8x256xbf16>
    %cst_24 = arith.constant dense<0.000000e+00> : vector<8x256xf32>
    %61 = tpu.matmul %60, %59, %cst_24 {dimension_numbers = #tpu.dot_dimension_numbers<[1], [0], [0], [1], [0, 0, 1, 1], [], []>} : vector<8x256xbf16>, vector<256x256xbf16>, vector<8x256xf32> -> vector<8x256xf32>
    %62 = vector.extract_strided_slice %8 {offsets = [4, 0], sizes = [1, 256], strides = [1, 1]} : vector<11x256xf32> to vector<1x256xf32>
    %63 = vector.broadcast %62 : vector<1x256xf32> to vector<8x256xf32>
    %64 = arith.addf %61, %63 : vector<8x256xf32>
    %cst_25 = arith.constant 0.000000e+00 : f32
    %65 = vector.broadcast %cst_25 : f32 to vector<8x256xf32>
    %66 = arith.cmpf oge, %64, %65 : vector<8x256xf32>
    %cst_26 = arith.constant 0.00999999977 : f32
    %67 = vector.broadcast %cst_26 : f32 to vector<8x256xf32>
    %68 = arith.mulf %67, %64 : vector<8x256xf32>
    %69 = arith.select %66, %64, %68 : vector<8x256xi1>, vector<8x256xf32>
    %c3 = arith.constant 3 : index
    %c0_27 = arith.constant 0 : index
    %c0_28 = arith.constant 0 : index
    %70 = vector.load %arg4[%c3, %c0_27, %c0_28] : memref<10x256x256xbf16, #tpu.memory_space<vmem>>, vector<1x256x256xbf16>
    %71 = vector.shape_cast %70 : vector<1x256x256xbf16> to vector<256x256xbf16>
    %72 = arith.truncf %69 : vector<8x256xf32> to vector<8x256xbf16>
    %cst_29 = arith.constant dense<0.000000e+00> : vector<8x256xf32>
    %73 = tpu.matmul %72, %71, %cst_29 {dimension_numbers = #tpu.dot_dimension_numbers<[1], [0], [0], [1], [0, 0, 1, 1], [], []>} : vector<8x256xbf16>, vector<256x256xbf16>, vector<8x256xf32> -> vector<8x256xf32>
    %74 = vector.extract_strided_slice %8 {offsets = [5, 0], sizes = [1, 256], strides = [1, 1]} : vector<11x256xf32> to vector<1x256xf32>
    %75 = vector.broadcast %74 : vector<1x256xf32> to vector<8x256xf32>
    %76 = arith.addf %73, %75 : vector<8x256xf32>
    %77 = vector.extract_strided_slice %9 {offsets = [1, 0], sizes = [1, 256], strides = [1, 1]} : vector<4x256xf32> to vector<1x256xf32>
    %78 = vector.broadcast %4 : vector<8x1xf32> to vector<8x256xf32>
    %79 = vector.broadcast %77 : vector<1x256xf32> to vector<8x256xf32>
    %80 = arith.mulf %78, %79 : vector<8x256xf32>
    %81 = vector.extract_strided_slice %8 {offsets = [6, 0], sizes = [1, 256], strides = [1, 1]} : vector<11x256xf32> to vector<1x256xf32>
    %82 = vector.broadcast %81 : vector<1x256xf32> to vector<8x256xf32>
    %83 = arith.addf %80, %82 : vector<8x256xf32>
    %cst_30 = arith.constant 0.000000e+00 : f32
    %84 = vector.broadcast %cst_30 : f32 to vector<8x256xf32>
    %85 = arith.cmpf oge, %83, %84 : vector<8x256xf32>
    %cst_31 = arith.constant 0.00999999977 : f32
    %86 = vector.broadcast %cst_31 : f32 to vector<8x256xf32>
    %87 = arith.mulf %86, %83 : vector<8x256xf32>
    %88 = arith.select %85, %83, %87 : vector<8x256xi1>, vector<8x256xf32>
    %c4 = arith.constant 4 : index
    %c0_32 = arith.constant 0 : index
    %c0_33 = arith.constant 0 : index
    %89 = vector.load %arg4[%c4, %c0_32, %c0_33] : memref<10x256x256xbf16, #tpu.memory_space<vmem>>, vector<1x256x256xbf16>
    %90 = vector.shape_cast %89 : vector<1x256x256xbf16> to vector<256x256xbf16>
    %91 = arith.truncf %88 : vector<8x256xf32> to vector<8x256xbf16>
    %cst_34 = arith.constant dense<0.000000e+00> : vector<8x256xf32>
    %92 = tpu.matmul %91, %90, %cst_34 {dimension_numbers = #tpu.dot_dimension_numbers<[1], [0], [0], [1], [0, 0, 1, 1], [], []>} : vector<8x256xbf16>, vector<256x256xbf16>, vector<8x256xf32> -> vector<8x256xf32>
    %93 = vector.extract_strided_slice %8 {offsets = [7, 0], sizes = [1, 256], strides = [1, 1]} : vector<11x256xf32> to vector<1x256xf32>
    %94 = vector.broadcast %93 : vector<1x256xf32> to vector<8x256xf32>
    %95 = arith.addf %92, %94 : vector<8x256xf32>
    %cst_35 = arith.constant 0.000000e+00 : f32
    %96 = vector.broadcast %cst_35 : f32 to vector<8x256xf32>
    %97 = arith.cmpf oge, %95, %96 : vector<8x256xf32>
    %cst_36 = arith.constant 0.00999999977 : f32
    %98 = vector.broadcast %cst_36 : f32 to vector<8x256xf32>
    %99 = arith.mulf %98, %95 : vector<8x256xf32>
    %100 = arith.select %97, %95, %99 : vector<8x256xi1>, vector<8x256xf32>
    %c5 = arith.constant 5 : index
    %c0_37 = arith.constant 0 : index
    %c0_38 = arith.constant 0 : index
    %101 = vector.load %arg4[%c5, %c0_37, %c0_38] : memref<10x256x256xbf16, #tpu.memory_space<vmem>>, vector<1x256x256xbf16>
    %102 = vector.shape_cast %101 : vector<1x256x256xbf16> to vector<256x256xbf16>
    %103 = arith.truncf %100 : vector<8x256xf32> to vector<8x256xbf16>
    %cst_39 = arith.constant dense<0.000000e+00> : vector<8x256xf32>
    %104 = tpu.matmul %103, %102, %cst_39 {dimension_numbers = #tpu.dot_dimension_numbers<[1], [0], [0], [1], [0, 0, 1, 1], [], []>} : vector<8x256xbf16>, vector<256x256xbf16>, vector<8x256xf32> -> vector<8x256xf32>
    %105 = vector.extract_strided_slice %8 {offsets = [8, 0], sizes = [1, 256], strides = [1, 1]} : vector<11x256xf32> to vector<1x256xf32>
    %106 = vector.broadcast %105 : vector<1x256xf32> to vector<8x256xf32>
    %107 = arith.addf %104, %106 : vector<8x256xf32>
    %c6 = arith.constant 6 : index
    %c0_40 = arith.constant 0 : index
    %c0_41 = arith.constant 0 : index
    %108 = vector.load %arg4[%c6, %c0_40, %c0_41] : memref<10x256x256xbf16, #tpu.memory_space<vmem>>, vector<1x256x256xbf16>
    %109 = vector.shape_cast %108 : vector<1x256x256xbf16> to vector<256x256xbf16>
    %110 = arith.truncf %76 : vector<8x256xf32> to vector<8x256xbf16>
    %cst_42 = arith.constant dense<0.000000e+00> : vector<8x256xf32>
    %111 = tpu.matmul %110, %109, %cst_42 {dimension_numbers = #tpu.dot_dimension_numbers<[1], [0], [0], [1], [0, 0, 1, 1], [], []>} : vector<8x256xbf16>, vector<256x256xbf16>, vector<8x256xf32> -> vector<8x256xf32>
    %c7 = arith.constant 7 : index
    %c0_43 = arith.constant 0 : index
    %c0_44 = arith.constant 0 : index
    %112 = vector.load %arg4[%c7, %c0_43, %c0_44] : memref<10x256x256xbf16, #tpu.memory_space<vmem>>, vector<1x256x256xbf16>
    %113 = vector.shape_cast %112 : vector<1x256x256xbf16> to vector<256x256xbf16>
    %114 = arith.truncf %45 : vector<8x256xf32> to vector<8x256xbf16>
    %cst_45 = arith.constant dense<0.000000e+00> : vector<8x256xf32>
    %115 = tpu.matmul %114, %113, %cst_45 {dimension_numbers = #tpu.dot_dimension_numbers<[1], [0], [0], [1], [0, 0, 1, 1], [], []>} : vector<8x256xbf16>, vector<256x256xbf16>, vector<8x256xf32> -> vector<8x256xf32>
    %116 = arith.addf %111, %115 : vector<8x256xf32>
    %c8 = arith.constant 8 : index
    %c0_46 = arith.constant 0 : index
    %c0_47 = arith.constant 0 : index
    %117 = vector.load %arg4[%c8, %c0_46, %c0_47] : memref<10x256x256xbf16, #tpu.memory_space<vmem>>, vector<1x256x256xbf16>
    %118 = vector.shape_cast %117 : vector<1x256x256xbf16> to vector<256x256xbf16>
    %119 = arith.truncf %107 : vector<8x256xf32> to vector<8x256xbf16>
    %cst_48 = arith.constant dense<0.000000e+00> : vector<8x256xf32>
    %120 = tpu.matmul %119, %118, %cst_48 {dimension_numbers = #tpu.dot_dimension_numbers<[1], [0], [0], [1], [0, 0, 1, 1], [], []>} : vector<8x256xbf16>, vector<256x256xbf16>, vector<8x256xf32> -> vector<8x256xf32>
    %121 = arith.addf %116, %120 : vector<8x256xf32>
    %122 = vector.extract_strided_slice %9 {offsets = [2, 0], sizes = [1, 256], strides = [1, 1]} : vector<4x256xf32> to vector<1x256xf32>
    %123 = vector.broadcast %3 : vector<8x1xf32> to vector<8x256xf32>
    %124 = vector.broadcast %122 : vector<1x256xf32> to vector<8x256xf32>
    %125 = arith.mulf %123, %124 : vector<8x256xf32>
    %126 = arith.addf %121, %125 : vector<8x256xf32>
    %127 = vector.extract_strided_slice %8 {offsets = [9, 0], sizes = [1, 256], strides = [1, 1]} : vector<11x256xf32> to vector<1x256xf32>
    %128 = vector.broadcast %127 : vector<1x256xf32> to vector<8x256xf32>
    %129 = arith.addf %126, %128 : vector<8x256xf32>
    %cst_49 = arith.constant 0.000000e+00 : f32
    %130 = vector.broadcast %cst_49 : f32 to vector<8x256xf32>
    %131 = arith.cmpf oge, %129, %130 : vector<8x256xf32>
    %cst_50 = arith.constant 0.00999999977 : f32
    %132 = vector.broadcast %cst_50 : f32 to vector<8x256xf32>
    %133 = arith.mulf %132, %129 : vector<8x256xf32>
    %134 = arith.select %131, %129, %133 : vector<8x256xi1>, vector<8x256xf32>
    %c9 = arith.constant 9 : index
    %c0_51 = arith.constant 0 : index
    %c0_52 = arith.constant 0 : index
    %135 = vector.load %arg4[%c9, %c0_51, %c0_52] : memref<10x256x256xbf16, #tpu.memory_space<vmem>>, vector<1x256x256xbf16>
    %136 = vector.shape_cast %135 : vector<1x256x256xbf16> to vector<256x256xbf16>
    %137 = arith.truncf %134 : vector<8x256xf32> to vector<8x256xbf16>
    %cst_53 = arith.constant dense<0.000000e+00> : vector<8x256xf32>
    %138 = tpu.matmul %137, %136, %cst_53 {dimension_numbers = #tpu.dot_dimension_numbers<[1], [0], [0], [1], [0, 0, 1, 1], [], []>} : vector<8x256xbf16>, vector<256x256xbf16>, vector<8x256xf32> -> vector<8x256xf32>
    %139 = vector.extract_strided_slice %8 {offsets = [10, 0], sizes = [1, 256], strides = [1, 1]} : vector<11x256xf32> to vector<1x256xf32>
    %140 = vector.broadcast %139 : vector<1x256xf32> to vector<8x256xf32>
    %141 = arith.addf %138, %140 : vector<8x256xf32>
    %cst_54 = arith.constant 0.000000e+00 : f32
    %142 = vector.broadcast %cst_54 : f32 to vector<8x256xf32>
    %143 = arith.cmpf oge, %141, %142 : vector<8x256xf32>
    %cst_55 = arith.constant 0.00999999977 : f32
    %144 = vector.broadcast %cst_55 : f32 to vector<8x256xf32>
    %145 = arith.mulf %144, %141 : vector<8x256xf32>
    %146 = arith.select %143, %141, %145 : vector<8x256xi1>, vector<8x256xf32>
    %147 = vector.extract_strided_slice %9 {offsets = [3, 0], sizes = [1, 256], strides = [1, 1]} : vector<4x256xf32> to vector<1x256xf32>
    %148 = vector.broadcast %147 : vector<1x256xf32> to vector<8x256xf32>
    %149 = arith.mulf %146, %148 : vector<8x256xf32>
    %cst_56 = arith.constant dense<0.000000e+00> : vector<8xf32>
    %150 = vector.multi_reduction <add>, %149, %cst_56 [1] : vector<8x256xf32> to vector<8xf32>
    %151 = vector.shape_cast %150 : vector<8xf32> to vector<8x1xf32>
    %c0_57 = arith.constant 0 : index
    %c0_58 = arith.constant 0 : index
    %152 = vector.load %arg7[%c0_57, %c0_58] : memref<1x1xf32, #tpu.memory_space<vmem>>, vector<1x1xf32>
    %153 = vector.broadcast %152 : vector<1x1xf32> to vector<8x1xf32>
    %154 = arith.addf %151, %153 : vector<8x1xf32>
    %c0_59 = arith.constant 0 : index
    %c0_60 = arith.constant 0 : index
    %155 = vector.load %arg8[%c0_59, %c0_60] : memref<8x1xf32, #tpu.memory_space<vmem>>, vector<8x1xf32>
    tpu.vector_store %arg8[%c0_59, %c0_60], %154 {strides = array<i32>} : memref<8x1xf32, #tpu.memory_space<vmem>>, vector<8x1xf32>,
    return
  }
  func.func @transform_0(%arg0: i32) -> (i32, i32) {
    %c0_i32 = arith.constant 0 : i32
    %c0_i32_0 = arith.constant 0 : i32
    return %arg0, %c0_i32 : i32, i32
  }
  func.func @transform_1(%arg0: i32) -> (i32, i32) {
    %c0_i32 = arith.constant 0 : i32
    %c0_i32_0 = arith.constant 0 : i32
    %c0_i32_1 = arith.constant 0 : i32
    return %c0_i32, %c0_i32_0 : i32, i32
  }
  func.func @transform_2(%arg0: i32) -> (i32, i32) {
    %c0_i32 = arith.constant 0 : i32
    %c0_i32_0 = arith.constant 0 : i32
    %c0_i32_1 = arith.constant 0 : i32
    return %c0_i32, %c0_i32_0 : i32, i32
  }
  func.func @transform_3(%arg0: i32) -> (i32, i32, i32) {
    %c0_i32 = arith.constant 0 : i32
    %c0_i32_0 = arith.constant 0 : i32
    %c0_i32_1 = arith.constant 0 : i32
    %c0_i32_2 = arith.constant 0 : i32
    return %c0_i32, %c0_i32_0, %c0_i32_1 : i32, i32, i32
  }
  func.func @transform_4(%arg0: i32) -> (i32, i32) {
    %c0_i32 = arith.constant 0 : i32
    %c0_i32_0 = arith.constant 0 : i32
    %c0_i32_1 = arith.constant 0 : i32
    return %c0_i32, %c0_i32_0 : i32, i32
  }
  func.func @transform_5(%arg0: i32) -> (i32, i32) {
    %c0_i32 = arith.constant 0 : i32
    %c0_i32_0 = arith.constant 0 : i32
    %c0_i32_1 = arith.constant 0 : i32
    return %c0_i32, %c0_i32_0 : i32, i32
  }
  func.func @transform_6(%arg0: i32) -> (i32, i32) {
    %c0_i32 = arith.constant 0 : i32
    %c0_i32_0 = arith.constant 0 : i32
    %c0_i32_1 = arith.constant 0 : i32
    return %c0_i32, %c0_i32_0 : i32, i32
  }
  func.func @transform_7(%arg0: i32) -> (i32, i32) {
    %c0_i32 = arith.constant 0 : i32
    %c0_i32_0 = arith.constant 0 : i32
    return %arg0, %c0_i32 : i32, i32
  }
}

</mosaic_0001>

<bundles_post_ra>
// kernel: score_network_forward.1
= control target key start
LH: loop header
LB: loop body
LE: loop exit
PB: predicated region body
PF: predicated region fallthrough
CT: control target
= control target key end

     0   :  { %s4251_s0 = inlined_call_operand.vmem [shape: f32[8,4], index: 0, kind: input, shape index: {}]   ;;  %s4252_s1 = inlined_call_operand.hbm [shape: f32[2,128], index: 1, kind: input, shape index: {}]   ;;  %s4253_s2 = inlined_call_operand.hbm [shape: bf16[128,256], index: 2, kind: input, shape index: {}]   ;;  %s4254_s3 = inlined_call_operand.hbm [shape: bf16[10,256,256], index: 3, kind: input, shape index: {}]   ;;  %s4255_s4 = inlined_call_operand.hbm [shape: f32[11,256], index: 4, kind: input, shape index: {}]   ;;  %s4256_s5 = inlined_call_operand.hbm [shape: f32[4,256], index: 5, kind: input, shape index: {}]   ;;  %s4257_s6 = inlined_call_operand.<no memory space> [shape: f32[1,1], index: 6, kind: input, shape index: {}]   ;;  %s4258_s7 = inlined_call_operand.vmem [shape: f32[8,1], index: 7, kind: output, shape index: {}]  }
   0x1   :  { %v12_v0 = vstv %s4257_s6 }
   0x2   :  { %13 = vst [vmem:[#allocation2] sm:$0x1] %v12_v0 }
   0x3   :  { %14 = vsyncpa [#allocation4], 0 }
   0x4   :  { %15 = vsyncpa [#allocation6], 0 }
   0x5   :  { %16 = vsyncpa [#allocation9], 0  ;;  %s3972_s26 = smov [#allocation5]   ;;  %s3856_s30 = scalar_lea.hbm %s4253_s2, 2048 }
   0x6   :  { %s34_s27 = sshll.u32 %s3972_s26, 4  ;;  %p3857_p0 = scmp.ne.s32.totalorder %s4253_s2, %s3856_s30  ;;  %s35_s27 = int_to_ptr.vmem [resolvable:$true] %s34_s27 }
   0x7   :  { %p3860_p1 = scmp.lt.u32.totalorder %s3856_s30, %s4253_s2 }
   0x9   :  { %p3862_p2 = pnand %p3860_p1, %p3857_p0 }
   0xb   :  { %3865 = shalt.err (!%p3862_p2)
}
   0xc   :  { %s3866_s6 = scalar_lea.vmem %s35_s27, 2048  ;;  %p3871_p4 = scmp.lt.s32.totalorder %s35_s27, %s35_s27 }
   0xd   :  { %p3867_p3 = scmp.ne.s32.totalorder %s35_s27, %s3866_s6  ;;  %p3872_p5 = scmp.lt.s32.totalorder %s3866_s6, %s3866_s6 }
   0xf   :  { %p3873_p6 = por %p3872_p5, %p3871_p4 }
  0x11   :  { %p3874_p7 = pnand %p3873_p6, %p3867_p3 }
  0x13   :  { %3877 = shalt.err (!%p3874_p7)
}
  0x14   :  { %s3973_s12 = smov 128   ;;  %s3974_s13 = smov 8  }
  0x15   :  { %40 = dma.hbm_to_vmem [thread:$0]  %s4253_s2, 2048, %s35_s27, [#allocation6], %s3973_s12, %s3973_s12, %s3974_s13  }
  0x16   :  { %s3975_s16 = smov [#allocation8]   ;;  %s3878_s20 = scalar_lea.hbm %s4255_s4, 512 }
  0x17   :  { %s58_s17 = sshll.u32 %s3975_s16, 4  ;;  %p3879_p8 = scmp.ne.s32.totalorder %s4255_s4, %s3878_s20  ;;  %s59_s17 = int_to_ptr.vmem [resolvable:$true] %s58_s17 }
  0x18   :  { %p3882_p9 = scmp.lt.u32.totalorder %s3878_s20, %s4255_s4 }
  0x1a   :  { %p3884_p10 = pnand %p3882_p9, %p3879_p8 }
  0x1c   :  { %3887 = shalt.err (!%p3884_p10)
}
  0x1d   :  { %s3888_s25 = scalar_lea.vmem %s59_s17, 512  ;;  %p3893_p12 = scmp.lt.s32.totalorder %s59_s17, %s59_s17 }
  0x1e   :  { %p3889_p11 = scmp.ne.s32.totalorder %s59_s17, %s3888_s25  ;;  %p3894_p13 = scmp.lt.s32.totalorder %s3888_s25, %s3888_s25 }
  0x20   :  { %p3895_p0 = por %p3894_p13, %p3893_p12 }
  0x22   :  { %p3896_p1 = pnand %p3895_p0, %p3889_p11 }
  0x24   :  { %3899 = shalt.err (!%p3896_p1)
}
  0x25   :  { %s3976_s2 = smov 256   ;;  %s3977_s26 = smov 16  }
  0x26   :  { %64 = dma.hbm_to_vmem [thread:$0]  %s4255_s4, 512, %s59_s17, [#allocation9], %s3976_s2, %s3976_s2, %s3977_s26  }
  0x27   :  { %s3978_s29 = smov [#allocation3]   ;;  %s3979_s8 = smov [#allocation7]  }
  0x28   :  { %s25_s30 = sshll.u32 %s3978_s29, 4  ;;  %s46_s9 = sshll.u32 %s3979_s8, 4  ;;  %s26_s30 = int_to_ptr.vmem [resolvable:$true] %s25_s30  ;;  %s4061_s9 = int_to_ptr.vmem [resolvable:$true] %s46_s9 }
  0x29   :  { %s3900_s6 = scalar_lea.hbm %s4252_s1, 32 }
  0x2a   :  { %p3901_p2 = scmp.ne.s32.totalorder %s4252_s1, %s3900_s6  ;;  %p3904_p3 = scmp.lt.u32.totalorder %s3900_s6, %s4252_s1 }
  0x2c   :  { %p3906_p4 = pnand %p3904_p3, %p3901_p2 }
  0x2e   :  { %3909 = shalt.err (!%p3906_p4)
}
  0x2f   :  { %s3910_s4 = scalar_lea.vmem %s26_s30, 32  ;;  %p3915_p6 = scmp.lt.s32.totalorder %s26_s30, %s26_s30 }
  0x30   :  { %p3911_p5 = scmp.ne.s32.totalorder %s26_s30, %s3910_s4  ;;  %p3916_p7 = scmp.lt.s32.totalorder %s3910_s4, %s3910_s4 }
  0x32   :  { %p3917_p8 = por %p3916_p7, %p3915_p6 }
  0x34   :  { %p3918_p9 = pnand %p3917_p8, %p3911_p5 }
  0x36   :  { %3921 = shalt.err (!%p3918_p9)
}
  0x37   :  { %28 = dma.hbm_to_vmem [thread:$0]  %s4252_s1, 32, %s26_s30, [#allocation4]  }
  0x38   :  { %s3922_s22 = scalar_lea.hbm %s4254_s3, 40960 }
  0x39   :  { %p3923_p10 = scmp.ne.s32.totalorder %s4254_s3, %s3922_s22  ;;  %p3926_p11 = scmp.lt.u32.totalorder %s3922_s22, %s4254_s3 }
  0x3b   :  { %p3928_p12 = pnand %p3926_p11, %p3923_p10 }
  0x3d   :  { %3931 = shalt.err (!%p3928_p12)
}
  0x3e   :  { %s3932_s26 = scalar_lea.vmem %s4061_s9, 40960  ;;  %p3937_p0 = scmp.lt.s32.totalorder %s4061_s9, %s4061_s9 }
  0x3f   :  { %p3933_p13 = scmp.ne.s32.totalorder %s4061_s9, %s3932_s26  ;;  %p3938_p1 = scmp.lt.s32.totalorder %s3932_s26, %s3932_s26 }
  0x41   :  { %p3939_p2 = por %p3938_p1, %p3937_p0 }
  0x43   :  { %p3940_p3 = pnand %p3939_p2, %p3933_p13 }
  0x45   :  { %3943 = shalt.err (!%p3940_p3)
}
  0x46   :  { %52 = dma.hbm_to_vmem [thread:$0]  %s4254_s3, 40960, %s4061_s9, [#allocation6], %s3973_s12, %s3973_s12, %s3974_s13  }
  0x47   :  { %s3980_s28 = smov [#allocation10]   ;;  %s3944_s10 = scalar_lea.hbm %s4256_s5, 128 }
  0x48   :  { %s71_s29 = sshll.u32 %s3980_s28, 4  ;;  %p3945_p4 = scmp.ne.s32.totalorder %s4256_s5, %s3944_s10  ;;  %s72_s29 = int_to_ptr.vmem [resolvable:$true] %s71_s29 }
  0x49   :  { %p3948_p5 = scmp.lt.u32.totalorder %s3944_s10, %s4256_s5 }
  0x4b   :  { %p3950_p6 = pnand %p3948_p5, %p3945_p4 }
  0x4d   :  { %3953 = shalt.err (!%p3950_p6)
}
  0x4e   :  { %s3954_s16 = scalar_lea.vmem %s72_s29, 128  ;;  %p3959_p8 = scmp.lt.s32.totalorder %s72_s29, %s72_s29 }
  0x4f   :  { %p3955_p7 = scmp.ne.s32.totalorder %s72_s29, %s3954_s16  ;;  %p3960_p9 = scmp.lt.s32.totalorder %s3954_s16, %s3954_s16 }
  0x51   :  { %p3961_p10 = por %p3960_p9, %p3959_p8 }
  0x53   :  { %p3962_p11 = pnand %p3961_p10, %p3955_p7 }
  0x55   :  { %3965 = shalt.err (!%p3962_p11)
}
  0x56   :  { %74 = dma.hbm_to_vmem [thread:$0]  %s4256_s5, 128, %s72_s29, [#allocation9]  }
  0x57   :  { %3966 = dma.done.wait [#allocation4], 32  }
  0x58   :  { %3967 = vsyncadd [#allocation4], 4294967264 }
  0x59   :  { %3968 = dma.done.wait [#allocation6], 43008  }
  0x5a   :  { %3969 = vsyncadd [#allocation6], 4294924288 }
  0x5b   :  { %3970 = dma.done.wait [#allocation9], 640  }
  0x5c   :  { %3971 = vsyncadd [#allocation9], 4294966656  ;;  %v3981_v1 = vmov 0   ;;  %v93_v2 = vld [vmem:[%s4251_s0] sm:$0xff]  ;;  %v3349_v6 = vld [vmem:[#allocation5 + $0x10] ss:$8 sps:$4 sm:$0xff]   ;;  %v105_v36 = vlaneseq }
  0x5d   :  { %3339 = vset.pattern.permute.xlu0 %v3981_v1  ;;  %356 = vmatprep.mubr.bf16.mxu0 %v3981_v1  ;;  %v3344_v3 = vld [vmem:[#allocation5 + $0x4] ss:$8 sps:$4 sm:$0xff]   ;;  %v3346_v4 = vld [vmem:[#allocation5] ss:$8 sps:$4 sm:$0xff]   ;;  %v3347_v5 = vld [vmem:[#allocation5 + $0x14] ss:$8 sps:$4 sm:$0xff]  }
  0x5e   :  { %102 = vperm.xlu0 %3339, %v93_v2   ;;  %324 = vmatprep.subr.bf16.mxu0 %v3344_v3  ;;  %v3350_v7 = vld [vmem:[#allocation5 + $0x24] ss:$8 sps:$4 sm:$0xff]   ;;  %v3352_v8 = vld [vmem:[#allocation5 + $0x20] ss:$8 sps:$4 sm:$0xff]   ;;  %v3353_v9 = vld [vmem:[#allocation5 + $0x34] ss:$8 sps:$4 sm:$0xff]  }
  0x5f   :  { %325 = vmatpush1.bf16.msra.mxu0 %v3346_v4  ;;  %v3355_v10 = vld [vmem:[#allocation5 + $0x30] ss:$8 sps:$4 sm:$0xff]   ;;  %v3356_v11 = vld [vmem:[#allocation5 + $0x44] ss:$8 sps:$4 sm:$0xff]   ;;  %v3358_v12 = vld [vmem:[#allocation5 + $0x40] ss:$8 sps:$4 sm:$0xff]  }
  0x60   :  { %326 = vmatprep.subr.bf16.mxu0 %v3347_v5  ;;  %v3359_v13 = vld [vmem:[#allocation5 + $0x54] ss:$8 sps:$4 sm:$0xff]   ;;  %v3361_v14 = vld [vmem:[#allocation5 + $0x50] ss:$8 sps:$4 sm:$0xff]   ;;  %v3362_v15 = vld [vmem:[#allocation5 + $0x64] ss:$8 sps:$4 sm:$0xff]  }
  0x61   :  { %v3364_v16 = vld [vmem:[#allocation5 + $0x60] ss:$8 sps:$4 sm:$0xff]   ;;  %v3365_v17 = vld [vmem:[#allocation5 + $0x74] ss:$8 sps:$4 sm:$0xff]   ;;  %v3367_v18 = vld [vmem:[#allocation5 + $0x70] ss:$8 sps:$4 sm:$0xff]  }
  0x62   :  { %v3368_v19 = vld [vmem:[#allocation7 + $0x4] ss:$8 sps:$4 sm:$0xff]   ;;  %v3370_v20 = vld [vmem:[#allocation7] ss:$8 sps:$4 sm:$0xff]   ;;  %v3982_v21 = vmov 1   ;;  %v3983_v23 = vmov 3  }
  0x63   :  { %327 = vmatpush1.bf16.msra.mxu0 %v3349_v6  ;;  %3340 = vset.pattern.permute.xlu0 %v3982_v21  ;;  %v3371_v22 = vld [vmem:[#allocation7 + $0x14] ss:$8 sps:$4 sm:$0xff]   ;;  %v3373_v24 = vld [vmem:[#allocation7 + $0x10] ss:$8 sps:$4 sm:$0xff]   ;;  %v3374_v25 = vld [vmem:[#allocation7 + $0x24] ss:$8 sps:$4 sm:$0xff]  }
  0x64   :  { %328 = vmatprep.subr.bf16.mxu0 %v3350_v7  ;;  %3341 = vset.pattern.permute.xlu1 %v3983_v23  ;;  %v3376_v26 = vld [vmem:[#allocation7 + $0x20] ss:$8 sps:$4 sm:$0xff]   ;;  %v3377_v27 = vld [vmem:[#allocation7 + $0x34] ss:$8 sps:$4 sm:$0xff]   ;;  %v3379_v28 = vld [vmem:[#allocation7 + $0x30] ss:$8 sps:$4 sm:$0xff]  }
  0x65   :  { %865 = vperm.xlu0 %3340, %v93_v2   ;;  %573 = vmatprep.subr.bf16.mxu1 %v3368_v19  ;;  %v3380_v29 = vld [vmem:[#allocation7 + $0x44] ss:$8 sps:$4 sm:$0xff]   ;;  %v3382_v30 = vld [vmem:[#allocation7 + $0x40] ss:$8 sps:$4 sm:$0xff]   ;;  %v3383_v31 = vld [vmem:[#allocation7 + $0x54] ss:$8 sps:$4 sm:$0xff]  }
  0x66   :  { %574 = vmatpush1.bf16.msra.mxu1 %v3370_v20  ;;  %1400 = vperm.xlu1 %3341, %v93_v2   ;;  %v3385_v32 = vld [vmem:[#allocation7 + $0x50] ss:$8 sps:$4 sm:$0xff]   ;;  %v3386_v33 = vld [vmem:[#allocation7 + $0x64] ss:$8 sps:$4 sm:$0xff]   ;;  %v3388_v34 = vld [vmem:[#allocation7 + $0x60] ss:$8 sps:$4 sm:$0xff]  }
  0x67   :  { %329 = vmatpush1.bf16.msra.mxu0 %v3352_v8  ;;  %575 = vmatprep.subr.bf16.mxu1 %v3371_v22  ;;  %v3389_v35 = vld [vmem:[#allocation7 + $0x74] ss:$8 sps:$4 sm:$0xff]   ;;  %v3391_v37 = vld [vmem:[#allocation7 + $0x70] ss:$8 sps:$4 sm:$0xff]   ;;  %v3392_v38 = vld [vmem:[#allocation7 + $0x84] ss:$8 sps:$4 sm:$0xff]  }
  0x68   :  { %330 = vmatprep.subr.bf16.mxu0 %v3353_v9  ;;  %v4110_v39 = vshrl.u32 %v105_v36, 7  ;;  %v3394_v40 = vld [vmem:[#allocation7 + $0x80] ss:$8 sps:$4 sm:$0xff]   ;;  %v3395_v41 = vld [vmem:[#allocation7 + $0x94] ss:$8 sps:$4 sm:$0xff]  }
  0x69   :  { %v94_v42 = vld [vmem:[#allocation3] sm:$0x3]  ;;  %v3397_v44 = vld [vmem:[#allocation7 + $0x90] ss:$8 sps:$4 sm:$0xff]   ;;  %v3398_v46 = vld [vmem:[#allocation7 + $0xa4] ss:$8 sps:$4 sm:$0xff]  }
  0x6a   :  { %576 = vmatpush1.bf16.msra.mxu1 %v3373_v24  ;;  %v4113_v43 = vsub.s32 0, %v4110_v39  ;;  %v4116_v45 = vsub.s32 1, %v4110_v39  ;;  %v3400_v50 = vld [vmem:[#allocation7 + $0xa0] ss:$8 sps:$4 sm:$0xff]   ;;  %v3401_v52 = vld [vmem:[#allocation7 + $0xb4] ss:$8 sps:$4 sm:$0xff]  }
  0x6b   :  { %331 = vmatpush1.bf16.msra.mxu0 %v3355_v10  ;;  %577 = vmatprep.subr.bf16.mxu1 %v3374_v25  ;;  %v3403_v54 = vld [vmem:[#allocation7 + $0xb0] ss:$8 sps:$4 sm:$0xff]   ;;  %v3404_v56 = vld [vmem:[#allocation7 + $0xc4] ss:$8 sps:$4 sm:$0xff]   ;;  %v3406_v58 = vld [vmem:[#allocation7 + $0xc0] ss:$8 sps:$4 sm:$0xff]  }
  0x6c   :  { %332 = vmatprep.subr.bf16.mxu0 %v3356_v11  ;;  %v108_v47 = vrot.slane %v94_v42, %v4113_v43  ;;  %v113_v48 = vrot.slane %v94_v42, %v4116_v45  ;;  %v3407_v60 = vld [vmem:[#allocation7 + $0xd4] ss:$8 sps:$4 sm:$0xff]   ;;  %v3409_v62 = vld [vmem:[#allocation7 + $0xd0] ss:$8 sps:$4 sm:$0xff]   ;;  %v3984_v5 = vmov 683565275  }
  0x6d   :  { %v3985_v7 = vmov 2475754826   ;;  %v3986_v10 = vmov 2131351028   ;;  %v3989_v19 = vmov 1326507024  }
  0x6e   :  { %578 = vmatpush1.bf16.msra.mxu1 %v3376_v26 }
  0x6f   :  { %333 = vmatpush1.bf16.msra.mxu0 %v3358_v12  ;;  %579 = vmatprep.subr.bf16.mxu1 %v3377_v27 }
  0x70   :  { %334 = vmatprep.subr.bf16.mxu0 %v3359_v13  ;;  %v3987_v13 = vmov 2102212464  }
  0x72   :  { %580 = vmatpush1.bf16.msra.mxu1 %v3379_v28 }
  0x73   :  { %335 = vmatpush1.bf16.msra.mxu0 %v3361_v14  ;;  %581 = vmatprep.subr.bf16.mxu1 %v3380_v29 }
  0x74   :  { %336 = vmatprep.subr.bf16.mxu0 %v3362_v15 }
  0x76   :  { %582 = vmatpush1.bf16.msra.mxu1 %v3382_v30 }
  0x77   :  { %337 = vmatpush1.bf16.msra.mxu0 %v3364_v16  ;;  %583 = vmatprep.subr.bf16.mxu1 %v3383_v31  ;;  %v3988_v16 = vmov 920167782  }
  0x78   :  { %338 = vmatprep.subr.bf16.mxu0 %v3365_v17 }
  0x7a   :  { %584 = vmatpush1.bf16.msra.mxu1 %v3385_v32 }
  0x7b   :  { %339 = vmatpush1.bf16.msra.mxu0 %v3367_v18  ;;  %585 = vmatprep.subr.bf16.mxu1 %v3386_v33 }
  0x7e   :  { %586 = vmatpush1.bf16.msra.mxu1 %v3388_v34 }
  0x7f   :  { %587 = vmatprep.subr.bf16.mxu1 %v3389_v35 }
  0x82   :  { %588 = vmatpush1.bf16.msra.mxu1 %v3391_v37 }
  0x83   :  { %589 = vmatprep.subr.bf16.mxu1 %v3392_v38 }
  0x86   :  { %590 = vmatpush1.bf16.msra.mxu1 %v3394_v40 }
  0x87   :  { %591 = vmatprep.subr.bf16.mxu1 %v3395_v41 }
  0x8a   :  { %592 = vmatpush1.bf16.msra.mxu1 %v3397_v44 }
  0x8b   :  { %593 = vmatprep.subr.bf16.mxu1 %v3398_v46 }
  0x8e   :  { %594 = vmatpush1.bf16.msra.mxu1 %v3400_v50 }
  0x8f   :  { %595 = vmatprep.subr.bf16.mxu1 %v3401_v52 }
  0x92   :  { %596 = vmatpush1.bf16.msra.mxu1 %v3403_v54 }
  0x93   :  { %597 = vmatprep.subr.bf16.mxu1 %v3404_v56 }
  0x96   :  { %598 = vmatpush1.bf16.msra.mxu1 %v3406_v58 }
  0x97   :  { %599 = vmatprep.subr.bf16.mxu1 %v3407_v60 }
  0x9a   :  { %600 = vmatpush1.bf16.msra.mxu1 %v3409_v62 }
  0xdd   :  { %v103_v49 = vpop.permute.xlu0 %102 }
  0xde   :  { %v109_v51 = vmul.f32 %v108_v47, %v103_v49 }
  0xe0   :  { %v4120_v53 = vadd.f32 %v113_v48, %v109_v51 }
  0xe2   :  { %v118_v55 = vand.u32 2139095040, %v4120_v53  ;;  %v115_v63 = vand.u32 2147483647, %v4120_v53  ;;  %vm117_vm7 = vcmp.lt.s32.totalorder %v4120_v53, 0  ;;  %vm207_vm12 = vweird.f32 %v4120_v53 }
  0xe4   :  { %v119_v57 = vshrl.u32 %v118_v55, 23  ;;  %v122_v2 = vand.u32 8388607, %v115_v63  ;;  %vm116_vm8 = vcmp.le.f32.partialorder %v115_v63, 0.7853982 }
  0xe6   :  { %v2975_v59 = vadd.s32 4294967169, %v119_v57  ;;  %v123_v21 = vor.u32 8388608, %v122_v2 }
  0xe8   :  { %v125_v61 = vadd.s32 1, %v2975_v59  ;;  %v163_v35 = vshll.u32 %v123_v21, 8 }
  0xea   :  { %vm126_vm0 = vcmp.gt.s32.totalorder %v125_v61, 0 }
  0xeb   :  { %v127_v0 = vsel %vm126_vm0, %v125_v61, 0 }
  0xec   :  { %v129_v1 = vand.u32 31, %v127_v0  ;;  %v128_v4 = vshrl.u32 %v127_v0, 5 }
  0xee   :  { %v130_v3 = vsub.s32 32, %v129_v1  ;;  %v132_v6 = vshll.u32 %v3984_v5, %v129_v1  ;;  %v135_v8 = vshll.u32 %v3985_v7, %v129_v1  ;;  %v138_v12 = vshll.u32 %v3986_v10, %v129_v1 }
  0xef   :  { %v141_v15 = vshll.u32 %v3987_v13, %v129_v1  ;;  %v144_v18 = vshll.u32 %v3988_v16, %v129_v1  ;;  %vm147_vm1 = vcmp.lt.s32.totalorder %v128_v4, 1  ;;  %vm150_vm2 = vcmp.lt.s32.totalorder %v128_v4, 4 }
  0xf0   :  { %v133_v9 = vshrl.u32 %v3985_v7, %v130_v3  ;;  %v136_v11 = vshrl.u32 %v3986_v10, %v130_v3  ;;  %v139_v14 = vshrl.u32 %v3987_v13, %v130_v3  ;;  %v142_v17 = vshrl.u32 %v3988_v16, %v130_v3 }
  0xf1   :  { %v145_v20 = vshrl.u32 %v3989_v19, %v130_v3  ;;  %v131_v30 = vshrl.u32 %v3984_v5, %v130_v3  ;;  %vm149_vm3 = vcmp.lt.s32.totalorder %v128_v4, 3  ;;  %vm148_vm4 = vcmp.lt.s32.totalorder %v128_v4, 2 }
  0xf2   :  { %v134_v22 = vor.u32 %v133_v9, %v132_v6  ;;  %v137_v23 = vor.u32 %v136_v11, %v135_v8  ;;  %v140_v24 = vor.u32 %v139_v14, %v138_v12  ;;  %v143_v25 = vor.u32 %v142_v17, %v141_v15 }
  0xf3   :  { %v146_v26 = vor.u32 %v145_v20, %v144_v18 }
  0xf4   :  { %v152_v27 = vsel %vm150_vm2, %v140_v24, 2102212464  ;;  %v155_v28 = vsel %vm147_vm1, %v134_v22, %v137_v23  ;;  %v159_v29 = vsel %vm147_vm1, %v137_v23, %v140_v24  ;;  %v156_v31 = vsel %vm150_vm2, %v143_v25, 920167782 }
  0xf5   :  { %v160_v32 = vsel %vm150_vm2, %v146_v26, 1326507024  ;;  %v157_v33 = vsel %vm149_vm3, %v140_v24, %v156_v31  ;;  %v151_v36 = vsel %vm147_vm1, %v131_v30, %v134_v22  ;;  %v153_v37 = vsel %vm149_vm3, %v137_v23, %v152_v27  ;;  %v3410_v27 = vld [vmem:[#allocation7 + $0xe4] ss:$8 sps:$4 sm:$0xff]   ;;  %v3415_v30 = vld [vmem:[#allocation7 + $0xf0] ss:$8 sps:$4 sm:$0xff]  }
  0xf6   :  { %v161_v34 = vsel %vm149_vm3, %v143_v25, %v160_v32  ;;  %v158_v38 = vsel %vm148_vm4, %v155_v28, %v157_v33  ;;  %v154_v47 = vsel %vm148_vm4, %v151_v36, %v153_v37  ;;  %v3412_v28 = vld [vmem:[#allocation7 + $0xe0] ss:$8 sps:$4 sm:$0xff]   ;;  %601 = vmatprep.subr.bf16.mxu1 %v3410_v27  ;;  %v3418_v31 = vld [vmem:[#allocation7 + $0x204] ss:$8 sps:$4 sm:$0xff]   ;;  %v4142_v32 = vsub.s32 4, %v4110_v39  ;;  %v4152_v36 = vpop.permute.xlu0 %865 }
  0xf7   :  { %v162_v40 = vsel %vm148_vm4, %v159_v29, %v161_v34  ;;  %v4129_v44 = vmul.u32.u64.low %v163_v35, %v158_v38  ;;  %v4130_v46 = vmul.u32.u64.high %v163_v35, %v158_v38, %v4129_v44  ;;  %v170_v49 = vmul.u32 %v163_v35, %v154_v47  ;;  %602 = vmatpush1.bf16.msra.mxu1 %v3412_v28  ;;  %v3413_v29 = vld [vmem:[#allocation7 + $0xf4] ss:$8 sps:$4 sm:$0xff]   ;;  %v4144_v33 = vld [vmem:[#allocation10] sm:$0xff]  ;;  %v4154_v37 = vld [vmem:[#allocation8 + $0x8] sm:$0xff] }
  0xf8   :  { %v4126_v41 = vmul.u32.u64.low %v163_v35, %v162_v40  ;;  %v4127_v42 = vmul.u32.u64.high %v163_v35, %v162_v40, %v4126_v41  ;;  %603 = vmatprep.subr.bf16.mxu1 %v3413_v29  ;;  %v4150_v35 = vsub.s32 3, %v4110_v39  ;;  %v3535_v27 = vld [vmem:[#allocation7 + $0x174] ss:$8 sps:$4 sm:$0xff]   ;;  %v3437_v28 = vld [vmem:[#allocation7 + $0x270] ss:$8 sps:$4 sm:$0xff]  }
  0xf9   :  { %v173_v48 = vadd.s32 1, %v4130_v46  ;;  %v4159_v41 = vld [vmem:[#allocation8] sm:$0xff] }
  0xfa   :  { %vm172_vm5 = vc.u32 %v4127_v42, %v4129_v44  ;;  %v171_v62 = vadd.s32 %v4129_v44, %v4127_v42  ;;  %v896_v38 = vrot.slane %v4154_v37, %v4150_v35  ;;  %v239_v44 = vrot.slane %v4159_v41, %v4113_v43  ;;  %v3442_v29 = vld [vmem:[#allocation7 + $0x284] ss:$8 sps:$4 sm:$0xff]  }
  0xfb   :  { %v174_v50 = vsel %vm172_vm5, %v173_v48, %v4130_v46  ;;  %604 = vmatpush1.bf16.msra.mxu1 %v3415_v30  ;;  %v243_v46 = vrot.slane %v4154_v37, %v4113_v43  ;;  %v3533_v30 = vld [vmem:[#allocation7 + $0x170] ss:$8 sps:$4 sm:$0xff]  }
  0xfc   :  { %v175_v51 = vadd.s32 %v174_v50, %v170_v49  ;;  %1108 = vmatprep.subr.bf16.mxu1 %v3418_v31  ;;  %v3538_v31 = vld [vmem:[#allocation7 + $0x184] ss:$8 sps:$4 sm:$0xff]  }
  0xfe   :  { %v176_v52 = vadd.s32 536870912, %v175_v51 }
 0x100   :  { %v177_v54 = vshrl.u32 %v176_v52, 30 }
 0x102   :  { %v178_v55 = vshll.u32 %v177_v54, 30  ;;  %v201_v11 = vsub.s32 4, %v177_v54 }
 0x104   :  { %v179_v56 = vsub.s32 %v175_v51, %v178_v55  ;;  %v202_v14 = vsel %vm117_vm7, %v201_v11, %v177_v54  ;;  %v3518_v11 = vld [vmem:[#allocation7 + $0x120] ss:$8 sps:$4 sm:$0xff]  }
 0x105   :  { %v204_v16 = vsel %vm116_vm8, 0, %v202_v14  ;;  %v3430_v14 = vld [vmem:[#allocation7 + $0x244] ss:$8 sps:$4 sm:$0xff]  }
 0x106   :  { %v181_v57 = vsub.s32 0, %v179_v56  ;;  %v208_v17 = vadd.s32 3, %v204_v16  ;;  %v3526_v16 = vld [vmem:[#allocation7 + $0x144] ss:$8 sps:$4 sm:$0xff]  }
 0x108   :  { %v2976_v58 = vmin.u32 %v181_v57, %v179_v56  ;;  %v209_v18 = vand.u32 3, %v208_v17  ;;  %v3428_v17 = vld [vmem:[#allocation7 + $0x240] ss:$8 sps:$4 sm:$0xff]  }
 0x10a   :  { %v183_v59 = vclz %v2976_v58  ;;  %vm214_vm9 = vcmp.eq.s32.totalorder %v209_v18, 2  ;;  %vm211_vm10 = vcmp.eq.s32.totalorder %v209_v18, 0  ;;  %vm210_vm11 = vcmp.lt.s32.totalorder %v209_v18, 2  ;;  %v3433_v18 = vld [vmem:[#allocation7 + $0x254] ss:$8 sps:$4 sm:$0xff]  }
 0x10c   :  { %v2977_v60 = vadd.s32 4294967294, %v183_v59 }
 0x10e   :  { %vm2978_vm6 = vcmp.lt.s32.totalorder %v2977_v60, 0 }
 0x10f   :  { %v186_v61 = vsel %vm2978_vm6, 0, %v2977_v60 }
 0x110   :  { %v187_v0 = vsub.s32 32, %v186_v61  ;;  %v191_v1 = vsub.s32 4294967266, %v186_v61  ;;  %v188_v2 = vshll.u32 %v179_v56, %v186_v61  ;;  %v3416_v61 = vld [vmem:[#allocation7 + $0x200] ss:$8 sps:$4 sm:$0xff]  }
 0x112   :  { %v189_v3 = vshrl.u32 %v171_v62, %v187_v0  ;;  %v192_v4 = vadd.s32 127, %v191_v1  ;;  %v3421_v1 = vld [vmem:[#allocation7 + $0x214] ss:$8 sps:$4 sm:$0xff]  }
 0x114   :  { %v190_v5 = vor.u32 %v189_v3, %v188_v2  ;;  %v193_v6 = vshll.u32 %v192_v4, 23  ;;  %v3512_v2 = vld [vmem:[#allocation7 + $0x100] ss:$8 sps:$4 sm:$0xff]   ;;  %v3514_v3 = vld [vmem:[#allocation7 + $0x104] ss:$8 sps:$4 sm:$0xff]  }
 0x115   :  { %v3419_v4 = vld [vmem:[#allocation7 + $0x210] ss:$8 sps:$4 sm:$0xff]   ;;  %823 = vmatprep.subr.bf16.mxu0 %v3514_v3 }
 0x116   :  { %v194_v7 = vor.u32 4788187, %v193_v6  ;;  %v197_v9 = vcvt.s32.f32 %v190_v5  ;;  %v3517_v5 = vld [vmem:[#allocation7 + $0x114] ss:$8 sps:$4 sm:$0xff]   ;;  %v3424_v6 = vld [vmem:[#allocation7 + $0x224] ss:$8 sps:$4 sm:$0xff]  }
 0x118   :  { %v195_v8 = vand.u32 2147483647, %v194_v7  ;;  %v3515_v7 = vld [vmem:[#allocation7 + $0x110] ss:$8 sps:$4 sm:$0xff]  }
 0x11a   :  { %v198_v10 = vmul.f32 %v197_v9, %v195_v8  ;;  %v3520_v8 = vld [vmem:[#allocation7 + $0x124] ss:$8 sps:$4 sm:$0xff]   ;;  %v3422_v9 = vld [vmem:[#allocation7 + $0x220] ss:$8 sps:$4 sm:$0xff]  }
 0x11c   :  { %v199_v12 = vxor.u32 2147483648, %v198_v10 }
 0x11e   :  { %v200_v13 = vsel %vm117_vm7, %v199_v12, %v198_v10  ;;  %v3427_v10 = vld [vmem:[#allocation7 + $0x234] ss:$8 sps:$4 sm:$0xff]  }
 0x11f   :  { %v203_v15 = vsel %vm116_vm8, %v4120_v53, %v200_v13  ;;  %v876_v53 = vrot.slane %v4144_v33, %v4142_v32  ;;  %v3523_v12 = vld [vmem:[#allocation7 + $0x134] ss:$8 sps:$4 sm:$0xff]   ;;  %v3425_v13 = vld [vmem:[#allocation7 + $0x230] ss:$8 sps:$4 sm:$0xff]  }
 0x120   :  { %3848 = vcosq.f32 %v203_v15 }
 0x121   :  { %3850 = vsinq.f32 %v203_v15  ;;  %v886_v34 = vrot.slane %v876_v53, %v4113_v43  ;;  %v3521_v15 = vld [vmem:[#allocation7 + $0x130] ss:$8 sps:$4 sm:$0xff]   ;;  %v3440_v53 = vld [vmem:[#allocation7 + $0x280] ss:$8 sps:$4 sm:$0xff]  }
 0x123   :  { %v888_v40 = vmul.f32 %v886_v34, %v4152_v36  ;;  %v3445_v34 = vld [vmem:[#allocation7 + $0x294] ss:$8 sps:$4 sm:$0xff]  }
 0x125   :  { %v898_v42 = vadd.f32 %v896_v38, %v888_v40  ;;  %v3536_v38 = vld [vmem:[#allocation7 + $0x180] ss:$8 sps:$4 sm:$0xff]   ;;  %v3541_v40 = vld [vmem:[#allocation7 + $0x194] ss:$8 sps:$4 sm:$0xff]  }
 0x127   :  { %v902_v48 = vmul.f32 0.01, %v898_v42  ;;  %vm900_vm13 = vcmp.ge.f32.partialorder %v898_v42, 0.0 }
 0x129   :  { %v904_v57 = vsel %vm900_vm13, %v898_v42, %v902_v48  ;;  %v3443_v42 = vld [vmem:[#allocation7 + $0x290] ss:$8 sps:$4 sm:$0xff]   ;;  %v3544_v48 = vld [vmem:[#allocation7 + $0x1a4] ss:$8 sps:$4 sm:$0xff]   ;;  %vm2966_vm13 = vcmask 7168  }
 0x12a   :  { %v3849_v19 = vpop.eup %3848  ;;  %v939_v62 = vpack.c.bf16 %v904_v57, %v904_v57  ;;  %v3454_v57 = vld [vmem:[#allocation7 + $0x2c4] ss:$8 sps:$4 sm:$0xff]  }
 0x12b   :  { %v3851_v20 = vpop.eup %3850  ;;  %v215_v21 = vxor.u32 2147483648, %v3849_v19 }
 0x12c   :  { %v212_v22 = vxor.u32 2147483648, %v3851_v20 }
 0x12d   :  { %v216_v23 = vsel %vm214_vm9, %v215_v21, %v3851_v20  ;;  %v3529_v20 = vld [vmem:[#allocation7 + $0x154] ss:$8 sps:$4 sm:$0xff]   ;;  %v3431_v21 = vld [vmem:[#allocation7 + $0x250] ss:$8 sps:$4 sm:$0xff]  }
 0x12e   :  { %v213_v24 = vsel %vm211_vm10, %v3849_v19, %v212_v22  ;;  %v3524_v19 = vld [vmem:[#allocation7 + $0x140] ss:$8 sps:$4 sm:$0xff]   ;;  %v3436_v22 = vld [vmem:[#allocation7 + $0x264] ss:$8 sps:$4 sm:$0xff]  }
 0x12f   :  { %v217_v63 = vsel %vm210_vm11, %v213_v24, %v216_v23  ;;  %v3527_v23 = vld [vmem:[#allocation7 + $0x150] ss:$8 sps:$4 sm:$0xff]   ;;  %v3532_v24 = vld [vmem:[#allocation7 + $0x164] ss:$8 sps:$4 sm:$0xff]  }
 0x130   :  { %v218_v25 = vsel %vm207_vm12, nan, %v217_v63  ;;  %v3434_v63 = vld [vmem:[#allocation7 + $0x260] ss:$8 sps:$4 sm:$0xff]  }
 0x131   :  { %v235_v26 = vpack.c.bf16 %v218_v25, %v218_v25  ;;  %v3439_v25 = vld [vmem:[#allocation7 + $0x274] ss:$8 sps:$4 sm:$0xff]  }
 0x133   :  { %357 = vmatmul.mubr.bf16.vlgmr.msra.gmra.mrb[0].mxu0 %v235_v26  ;;  %v3530_v26 = vld [vmem:[#allocation7 + $0x160] ss:$8 sps:$4 sm:$0xff]  }
 0x134   :  { %824 = vmatpush1.bf16.msra.mxu0 %v3512_v2  ;;  %v3457_v2 = vld [vmem:[#allocation7 + $0x2d4] ss:$8 sps:$4 sm:$0xff]  }
 0x135   :  { %825 = vmatprep.subr.bf16.mxu0 %v3517_v5  ;;  %v892_v5 = vrot.slane %v4159_v41, %v4150_v35 }
 0x138   :  { %826 = vmatpush1.bf16.msra.mxu0 %v3515_v7  ;;  %v3548_v7 = vld [vmem:[#allocation7 + $0x1c0] ss:$8 sps:$4 sm:$0xff]  }
 0x139   :  { %827 = vmatprep.subr.bf16.mxu0 %v3520_v8  ;;  %v3553_v8 = vld [vmem:[#allocation7 + $0x1d4] ss:$8 sps:$4 sm:$0xff]  }
 0x13c   :  { %828 = vmatpush1.bf16.msra.mxu0 %v3518_v11 }
 0x13d   :  { %829 = vmatprep.subr.bf16.mxu0 %v3523_v12 }
 0x140   :  { %830 = vmatpush1.bf16.msra.mxu0 %v3521_v15  ;;  %v3463_v15 = vld [vmem:[#allocation7 + $0x2f4] ss:$8 sps:$4 sm:$0xff]  }
 0x141   :  { %831 = vmatprep.subr.bf16.mxu0 %v3526_v16 }
 0x144   :  { %832 = vmatpush1.bf16.msra.mxu0 %v3524_v19 }
 0x145   :  { %833 = vmatprep.subr.bf16.mxu0 %v3529_v20 }
 0x148   :  { %834 = vmatpush1.bf16.msra.mxu0 %v3527_v23 }
 0x149   :  { %835 = vmatprep.subr.bf16.mxu0 %v3532_v24  ;;  %v3469_v24 = vld [vmem:[#allocation7 + $0x414] ss:$8 sps:$4 sm:$0xff]  }
 0x14c   :  { %836 = vmatpush1.bf16.msra.mxu0 %v3530_v26  ;;  %v3470_v26 = vld [vmem:[#allocation7 + $0x420] ss:$8 sps:$4 sm:$0xff]  }
 0x14d   :  { %837 = vmatprep.subr.bf16.mxu0 %v3535_v27  ;;  %v3475_v27 = vld [vmem:[#allocation7 + $0x434] ss:$8 sps:$4 sm:$0xff]  }
 0x150   :  { %838 = vmatpush1.bf16.msra.mxu0 %v3533_v30  ;;  %v3476_v30 = vld [vmem:[#allocation7 + $0x440] ss:$8 sps:$4 sm:$0xff]  }
 0x151   :  { %839 = vmatprep.subr.bf16.mxu0 %v3538_v31  ;;  %v3481_v31 = vld [vmem:[#allocation7 + $0x454] ss:$8 sps:$4 sm:$0xff]  }
 0x154   :  { %840 = vmatpush1.bf16.msra.mxu0 %v3536_v38  ;;  %v3556_v38 = vld [vmem:[#allocation7 + $0x1e4] ss:$8 sps:$4 sm:$0xff]  }
 0x155   :  { %841 = vmatprep.subr.bf16.mxu0 %v3541_v40  ;;  %v3554_v40 = vld [vmem:[#allocation7 + $0x1e0] ss:$8 sps:$4 sm:$0xff]  }
 0x206   :  { %v358_v47 = vpop.f32.mrb[0].mxu0 }
 0x207   :  { %v359_v49 = vadd.f32 %v358_v47, %v239_v44  ;;  %v360_v50 = vpop.f32.mrb[1].mxu0  ;;  %v3448_v44 = vld [vmem:[#allocation7 + $0x2a4] ss:$8 sps:$4 sm:$0xff]   ;;  %v3539_v47 = vld [vmem:[#allocation7 + $0x190] ss:$8 sps:$4 sm:$0xff]  }
 0x208   :  { %v361_v51 = vadd.f32 %v360_v50, %v243_v46  ;;  %v362_v52 = vpop.f32.mrb[2].mxu0  ;;  %v4166_v46 = vsub.s32 5, %v4110_v39  ;;  %v3451_v50 = vld [vmem:[#allocation7 + $0x2b4] ss:$8 sps:$4 sm:$0xff]   ;;  %842 = vmatpush1.bf16.msra.mxu0 %v3539_v47 }
 0x209   :  { %vm365_vm14 = vcmp.ge.f32.partialorder %v359_v49, 0.0  ;;  %v367_v54 = vmul.f32 0.01, %v359_v49  ;;  %v363_v55 = vpop.f32.mrb[3].mxu0  ;;  %v872_v52 = vrot.slane %v4144_v33, %v4113_v43  ;;  %843 = vmatprep.subr.bf16.mxu0 %v3544_v48  ;;  %v3559_v47 = vld [vmem:[#allocation7 + $0x1f4] ss:$8 sps:$4 sm:$0xff]  }
 0x20a   :  { %vm366_vm15 = vcmp.ge.f32.partialorder %v361_v51, 0.0  ;;  %v368_v56 = vmul.f32 0.01, %v361_v51  ;;  %v3547_v55 = vld [vmem:[#allocation7 + $0x1b4] ss:$8 sps:$4 sm:$0xff]  }
 0x20b   :  { %v369_v58 = vsel %vm365_vm14, %v359_v49, %v367_v54  ;;  %v3446_v49 = vld [vmem:[#allocation7 + $0x2a0] ss:$8 sps:$4 sm:$0xff]   ;;  %v3557_v48 = vld [vmem:[#allocation7 + $0x1f0] ss:$8 sps:$4 sm:$0xff]  }
 0x20c   :  { %v370_v59 = vsel %vm366_vm15, %v361_v51, %v368_v56  ;;  %v403_v0 = vpack.c.bf16 %v369_v58, %v369_v58  ;;  %v1410_v51 = vrot.slane %v4144_v33, %v4166_v46  ;;  %v3542_v54 = vld [vmem:[#allocation7 + $0x1a0] ss:$8 sps:$4 sm:$0xff]   ;;  %v3449_v56 = vld [vmem:[#allocation7 + $0x2b0] ss:$8 sps:$4 sm:$0xff]  }
 0x20d   :  { %v404_v60 = vpack.c.bf16 %v370_v59, %v370_v59  ;;  %v4174_v59 = vsub.s32 6, %v4110_v39  ;;  %844 = vmatpush1.bf16.msra.mxu0 %v3542_v54  ;;  %v3493_v54 = vld [vmem:[#allocation7 + $0x494] ss:$8 sps:$4 sm:$0xff]  }
 0x20e   :  { %v1420_v58 = vrot.slane %v1410_v51, %v4116_v45  ;;  %845 = vmatprep.subr.bf16.mxu0 %v3547_v55  ;;  %v3562_v51 = vld [vmem:[#allocation7 + $0x304] ss:$8 sps:$4 sm:$0xff]   ;;  %v3491_v55 = vld [vmem:[#allocation7 + $0x490] ss:$8 sps:$4 sm:$0xff]  }
 0x20f   :  { %605 = vmatprep.mubr.bf16.mxu1 %v404_v60  ;;  %v882_v60 = vrot.slane %v872_v52, %v4113_v43  ;;  %v1430_v3 = vrot.slane %v4154_v37, %v4174_v59  ;;  %v3488_v52 = vld [vmem:[#allocation7 + $0x480] ss:$8 sps:$4 sm:$0xff]  }
 0x210   :  { %606 = vmatmul.mubr.bf16.vlgmr.msra.gmra.mrb[0].mxu1 %v403_v0  ;;  %v3550_v0 = vld [vmem:[#allocation7 + $0x1c4] ss:$8 sps:$4 sm:$0xff]  }
 0x211   :  { %1109 = vmatpush1.bf16.msra.mxu1 %v3416_v61  ;;  %1140 = vmatprep.mubr.bf16.mxu1 %v939_v62  ;;  %v4177_v61 = vpop.permute.xlu1 %1400  ;;  %v3545_v62 = vld [vmem:[#allocation7 + $0x1b0] ss:$8 sps:$4 sm:$0xff]  }
 0x212   :  { %1110 = vmatprep.subr.bf16.mxu1 %v3421_v1  ;;  %v3452_v1 = vld [vmem:[#allocation7 + $0x2c0] ss:$8 sps:$4 sm:$0xff]   ;;  %846 = vmatpush1.bf16.msra.mxu0 %v3545_v62  ;;  %v3497_v62 = vld [vmem:[#allocation7 + $0x4b0] ss:$8 sps:$4 sm:$0xff]  }
 0x213   :  { %847 = vmatprep.subr.bf16.mxu0 %v3550_v0  ;;  %v3502_v0 = vld [vmem:[#allocation7 + $0x4c4] ss:$8 sps:$4 sm:$0xff]  }
 0x215   :  { %1111 = vmatpush1.bf16.msra.mxu1 %v3419_v4  ;;  %v1422_v4 = vmul.f32 %v1420_v58, %v4177_v61  ;;  %v3499_v58 = vld [vmem:[#allocation7 + $0x4b4] ss:$8 sps:$4 sm:$0xff]  }
 0x216   :  { %1112 = vmatprep.subr.bf16.mxu1 %v3424_v6  ;;  %v887_v6 = vmul.f32 %v882_v60, %v4152_v36  ;;  %848 = vmatpush1.bf16.msra.mxu0 %v3548_v7  ;;  %v3461_v36 = vld [vmem:[#allocation7 + $0x2f0] ss:$8 sps:$4 sm:$0xff]   ;;  %v1406_v60 = vrot.slane %v4144_v33, %v4116_v45  ;;  %v3508_v7 = vld [vmem:[#allocation7 + $0x4e4] ss:$8 sps:$4 sm:$0xff]  }
 0x217   :  { %v1432_v11 = vadd.f32 %v1430_v3, %v1422_v4  ;;  %849 = vmatprep.subr.bf16.mxu0 %v3553_v8  ;;  %v3505_v3 = vld [vmem:[#allocation7 + $0x4d4] ss:$8 sps:$4 sm:$0xff]   ;;  %v1426_v4 = vrot.slane %v4159_v41, %v4174_v59  ;;  %v3506_v8 = vld [vmem:[#allocation7 + $0x4e0] ss:$8 sps:$4 sm:$0xff]  }
 0x218   :  { %v897_v12 = vadd.f32 %v892_v5, %v887_v6  ;;  %v3503_v6 = vld [vmem:[#allocation7 + $0x4d0] ss:$8 sps:$4 sm:$0xff]  }
 0x219   :  { %1113 = vmatpush1.bf16.msra.mxu1 %v3422_v9  ;;  %v3455_v9 = vld [vmem:[#allocation7 + $0x2d0] ss:$8 sps:$4 sm:$0xff]   ;;  %v1436_v16 = vmul.f32 0.01, %v1432_v11  ;;  %vm1434_vm0 = vcmp.ge.f32.partialorder %v1432_v11, 0.0 }
 0x21a   :  { %1114 = vmatprep.subr.bf16.mxu1 %v3427_v10  ;;  %v3460_v10 = vld [vmem:[#allocation7 + $0x2e4] ss:$8 sps:$4 sm:$0xff]   ;;  %vm899_vm1 = vcmp.ge.f32.partialorder %v897_v12, 0.0 }
 0x21b   :  { %v1438_v19 = vsel %vm1434_vm0, %v1432_v11, %v1436_v16  ;;  %v3509_v11 = vld [vmem:[#allocation7 + $0x4f0] ss:$8 sps:$4 sm:$0xff]  }
 0x21d   :  { %1115 = vmatpush1.bf16.msra.mxu1 %v3425_v13  ;;  %v3551_v13 = vld [vmem:[#allocation7 + $0x1d0] ss:$8 sps:$4 sm:$0xff]  }
 0x21e   :  { %1116 = vmatprep.subr.bf16.mxu1 %v3430_v14  ;;  %v3458_v14 = vld [vmem:[#allocation7 + $0x2e0] ss:$8 sps:$4 sm:$0xff]   ;;  %850 = vmatpush1.bf16.msra.mxu0 %v3551_v13 }
 0x21f   :  { %851 = vmatprep.subr.bf16.mxu0 %v3556_v38  ;;  %v3566_v38 = vld [vmem:[#allocation7 + $0x320] ss:$8 sps:$4 sm:$0xff]  }
 0x221   :  { %1117 = vmatpush1.bf16.msra.mxu1 %v3428_v17  ;;  %v901_v17 = vmul.f32 0.01, %v897_v12 }
 0x222   :  { %1118 = vmatprep.subr.bf16.mxu1 %v3433_v18  ;;  %v3466_v18 = vld [vmem:[#allocation7 + $0x404] ss:$8 sps:$4 sm:$0xff]   ;;  %852 = vmatpush1.bf16.msra.mxu0 %v3554_v40  ;;  %v3571_v40 = vld [vmem:[#allocation7 + $0x334] ss:$8 sps:$4 sm:$0xff]  }
 0x223   :  { %v903_v20 = vsel %vm899_vm1, %v897_v12, %v901_v17  ;;  %853 = vmatprep.subr.bf16.mxu0 %v3559_v47  ;;  %v3569_v47 = vld [vmem:[#allocation7 + $0x330] ss:$8 sps:$4 sm:$0xff]  }
 0x224   :  { %v938_v23 = vpack.c.bf16 %v903_v20, %v903_v20 }
 0x225   :  { %1119 = vmatpush1.bf16.msra.mxu1 %v3431_v21  ;;  %v3464_v21 = vld [vmem:[#allocation7 + $0x400] ss:$8 sps:$4 sm:$0xff]  }
 0x226   :  { %1120 = vmatprep.subr.bf16.mxu1 %v3436_v22  ;;  %v1473_v22 = vpack.c.bf16 %v1438_v19, %v1438_v19  ;;  %854 = vmatpush1.bf16.msra.mxu0 %v3557_v48  ;;  %v3574_v48 = vld [vmem:[#allocation7 + $0x344] ss:$8 sps:$4 sm:$0xff]  }
 0x227   :  { %1358 = vmatprep.subr.bf16.mxu0 %v3562_v51  ;;  %v3572_v51 = vld [vmem:[#allocation7 + $0x340] ss:$8 sps:$4 sm:$0xff]  }
 0x229   :  { %1121 = vmatpush1.bf16.msra.mxu1 %v3434_v63  ;;  %v3467_v63 = vld [vmem:[#allocation7 + $0x410] ss:$8 sps:$4 sm:$0xff]  }
 0x22a   :  { %1122 = vmatprep.subr.bf16.mxu1 %v3439_v25  ;;  %v3472_v25 = vld [vmem:[#allocation7 + $0x424] ss:$8 sps:$4 sm:$0xff]  }
 0x22d   :  { %1123 = vmatpush1.bf16.msra.mxu1 %v3437_v28  ;;  %v3473_v28 = vld [vmem:[#allocation7 + $0x430] ss:$8 sps:$4 sm:$0xff]  }
 0x22e   :  { %1124 = vmatprep.subr.bf16.mxu1 %v3442_v29  ;;  %v3478_v29 = vld [vmem:[#allocation7 + $0x444] ss:$8 sps:$4 sm:$0xff]  }
 0x231   :  { %1125 = vmatpush1.bf16.msra.mxu1 %v3440_v53  ;;  %v3479_v53 = vld [vmem:[#allocation7 + $0x450] ss:$8 sps:$4 sm:$0xff]  }
 0x232   :  { %1126 = vmatprep.subr.bf16.mxu1 %v3445_v34  ;;  %v3484_v34 = vld [vmem:[#allocation7 + $0x464] ss:$8 sps:$4 sm:$0xff]  }
 0x235   :  { %1127 = vmatpush1.bf16.msra.mxu1 %v3443_v42  ;;  %v3482_v42 = vld [vmem:[#allocation7 + $0x460] ss:$8 sps:$4 sm:$0xff]  }
 0x236   :  { %1128 = vmatprep.subr.bf16.mxu1 %v3448_v44  ;;  %v3487_v44 = vld [vmem:[#allocation7 + $0x474] ss:$8 sps:$4 sm:$0xff]  }
 0x239   :  { %1129 = vmatpush1.bf16.msra.mxu1 %v3446_v49  ;;  %v3485_v49 = vld [vmem:[#allocation7 + $0x470] ss:$8 sps:$4 sm:$0xff]  }
 0x23a   :  { %1130 = vmatprep.subr.bf16.mxu1 %v3451_v50  ;;  %v3490_v50 = vld [vmem:[#allocation7 + $0x484] ss:$8 sps:$4 sm:$0xff]  }
 0x23d   :  { %1131 = vmatpush1.bf16.msra.mxu1 %v3449_v56  ;;  %v3496_v56 = vld [vmem:[#allocation7 + $0x4a4] ss:$8 sps:$4 sm:$0xff]  }
 0x23e   :  { %1132 = vmatprep.subr.bf16.mxu1 %v3454_v57  ;;  %v3494_v57 = vld [vmem:[#allocation7 + $0x4a0] ss:$8 sps:$4 sm:$0xff]  }
 0x241   :  { %1133 = vmatpush1.bf16.msra.mxu1 %v3452_v1  ;;  %v1416_v1 = vrot.slane %v1406_v60, %v4116_v45  ;;  %v3676_v60 = vld [vmem:[#allocation7 + $0x764] ss:$8 sps:$4 sm:$0xff]  }
 0x242   :  { %1134 = vmatprep.subr.bf16.mxu1 %v3457_v2  ;;  %v3500_v2 = vld [vmem:[#allocation7 + $0x4c0] ss:$8 sps:$4 sm:$0xff]  }
 0x243   :  { %v1421_v5 = vmul.f32 %v1416_v1, %v4177_v61  ;;  %v408_v61 = vrot.slane %v4159_v41, %v4116_v45  ;;  %v3674_v1 = vld [vmem:[#allocation7 + $0x760] ss:$8 sps:$4 sm:$0xff]  }
 0x245   :  { %1135 = vmatpush1.bf16.msra.mxu1 %v3455_v9  ;;  %v1431_v33 = vadd.f32 %v1426_v4, %v1421_v5  ;;  %v3511_v9 = vld [vmem:[#allocation7 + $0x4f4] ss:$8 sps:$4 sm:$0xff]   ;;  %v3586_v4 = vld [vmem:[#allocation7 + $0x384] ss:$8 sps:$4 sm:$0xff]   ;;  %v3677_v5 = vld [vmem:[#allocation7 + $0x770] ss:$8 sps:$4 sm:$0xff]  }
 0x246   :  { %1136 = vmatprep.subr.bf16.mxu1 %v3460_v10 }
 0x247   :  { %v1435_v10 = vmul.f32 0.01, %v1431_v33  ;;  %vm1433_vm2 = vcmp.ge.f32.partialorder %v1431_v33, 0.0 }
 0x249   :  { %1137 = vmatpush1.bf16.msra.mxu1 %v3458_v14  ;;  %v1437_v12 = vsel %vm1433_vm2, %v1431_v33, %v1435_v10  ;;  %v412_v14 = vrot.slane %v4154_v37, %v4116_v45  ;;  %v3589_v33 = vld [vmem:[#allocation7 + $0x394] ss:$8 sps:$4 sm:$0xff]   ;;  %v3587_v10 = vld [vmem:[#allocation7 + $0x390] ss:$8 sps:$4 sm:$0xff]  }
 0x24a   :  { %1138 = vmatprep.subr.bf16.mxu1 %v3463_v15  ;;  %v1472_v13 = vpack.c.bf16 %v1437_v12, %v1437_v12  ;;  %v3683_v12 = vld [vmem:[#allocation7 + $0x790] ss:$8 sps:$4 sm:$0xff]  }
 0x24d   :  { %1139 = vmatpush1.bf16.msra.mxu1 %v3461_v36 }
 0x24e   :  { %1642 = vmatprep.subr.bf16.mxu1 %v3466_v18 }
 0x250   :  { %1141 = vmatmul.mubr.bf16.vlgmr.msra.gmra.mrb[4].mxu1 %v938_v23 }
 0x251   :  { %1643 = vmatpush1.bf16.msra.mxu1 %v3464_v21  ;;  %1674 = vmatprep.mubr.bf16.mxu1 %v1473_v22 }
 0x252   :  { %1644 = vmatprep.subr.bf16.mxu1 %v3469_v24 }
 0x255   :  { %1645 = vmatpush1.bf16.msra.mxu1 %v3467_v63  ;;  %v3560_v63 = vld [vmem:[#allocation7 + $0x300] ss:$8 sps:$4 sm:$0xff]  }
 0x256   :  { %1646 = vmatprep.subr.bf16.mxu1 %v3472_v25 }
 0x259   :  { %1647 = vmatpush1.bf16.msra.mxu1 %v3470_v26  ;;  %v3565_v26 = vld [vmem:[#allocation7 + $0x314] ss:$8 sps:$4 sm:$0xff]  }
 0x25a   :  { %1648 = vmatprep.subr.bf16.mxu1 %v3475_v27  ;;  %v3656_v27 = vld [vmem:[#allocation7 + $0x700] ss:$8 sps:$4 sm:$0xff]  }
 0x25d   :  { %1649 = vmatpush1.bf16.msra.mxu1 %v3473_v28  ;;  %v3658_v28 = vld [vmem:[#allocation7 + $0x704] ss:$8 sps:$4 sm:$0xff]  }
 0x25e   :  { %1650 = vmatprep.subr.bf16.mxu1 %v3478_v29  ;;  %v3563_v29 = vld [vmem:[#allocation7 + $0x310] ss:$8 sps:$4 sm:$0xff]  }
 0x261   :  { %1651 = vmatpush1.bf16.msra.mxu1 %v3476_v30  ;;  %v3661_v30 = vld [vmem:[#allocation7 + $0x714] ss:$8 sps:$4 sm:$0xff]  }
 0x262   :  { %1652 = vmatprep.subr.bf16.mxu1 %v3481_v31  ;;  %v3568_v31 = vld [vmem:[#allocation7 + $0x324] ss:$8 sps:$4 sm:$0xff]  }
 0x265   :  { %1653 = vmatpush1.bf16.msra.mxu1 %v3479_v53  ;;  %v3659_v53 = vld [vmem:[#allocation7 + $0x710] ss:$8 sps:$4 sm:$0xff]  }
 0x266   :  { %1654 = vmatprep.subr.bf16.mxu1 %v3484_v34  ;;  %v3664_v34 = vld [vmem:[#allocation7 + $0x724] ss:$8 sps:$4 sm:$0xff]  }
 0x269   :  { %1655 = vmatpush1.bf16.msra.mxu1 %v3482_v42  ;;  %v3662_v42 = vld [vmem:[#allocation7 + $0x720] ss:$8 sps:$4 sm:$0xff]  }
 0x26a   :  { %1656 = vmatprep.subr.bf16.mxu1 %v3487_v44  ;;  %v3667_v44 = vld [vmem:[#allocation7 + $0x734] ss:$8 sps:$4 sm:$0xff]  }
 0x26d   :  { %1657 = vmatpush1.bf16.msra.mxu1 %v3485_v49  ;;  %v3665_v49 = vld [vmem:[#allocation7 + $0x730] ss:$8 sps:$4 sm:$0xff]  }
 0x26e   :  { %1658 = vmatprep.subr.bf16.mxu1 %v3490_v50  ;;  %v3670_v50 = vld [vmem:[#allocation7 + $0x744] ss:$8 sps:$4 sm:$0xff]  }
 0x271   :  { %1659 = vmatpush1.bf16.msra.mxu1 %v3488_v52  ;;  %v3577_v52 = vld [vmem:[#allocation7 + $0x354] ss:$8 sps:$4 sm:$0xff]  }
 0x272   :  { %1660 = vmatprep.subr.bf16.mxu1 %v3493_v54  ;;  %v3668_v54 = vld [vmem:[#allocation7 + $0x740] ss:$8 sps:$4 sm:$0xff]  }
 0x275   :  { %1661 = vmatpush1.bf16.msra.mxu1 %v3491_v55  ;;  %v3673_v55 = vld [vmem:[#allocation7 + $0x754] ss:$8 sps:$4 sm:$0xff]  }
 0x276   :  { %1662 = vmatprep.subr.bf16.mxu1 %v3496_v56  ;;  %v3575_v56 = vld [vmem:[#allocation7 + $0x350] ss:$8 sps:$4 sm:$0xff]  }
 0x279   :  { %1663 = vmatpush1.bf16.msra.mxu1 %v3494_v57  ;;  %v3580_v57 = vld [vmem:[#allocation7 + $0x364] ss:$8 sps:$4 sm:$0xff]  }
 0x27a   :  { %1664 = vmatprep.subr.bf16.mxu1 %v3499_v58  ;;  %v3671_v58 = vld [vmem:[#allocation7 + $0x750] ss:$8 sps:$4 sm:$0xff]  }
 0x27d   :  { %1665 = vmatpush1.bf16.msra.mxu1 %v3497_v62  ;;  %v3578_v62 = vld [vmem:[#allocation7 + $0x360] ss:$8 sps:$4 sm:$0xff]  }
 0x27e   :  { %1666 = vmatprep.subr.bf16.mxu1 %v3502_v0  ;;  %v3583_v0 = vld [vmem:[#allocation7 + $0x374] ss:$8 sps:$4 sm:$0xff]  }
 0x281   :  { %1667 = vmatpush1.bf16.msra.mxu1 %v3500_v2  ;;  %v3679_v2 = vld [vmem:[#allocation7 + $0x774] ss:$8 sps:$4 sm:$0xff]  }
 0x282   :  { %1668 = vmatprep.subr.bf16.mxu1 %v3505_v3  ;;  %v3581_v3 = vld [vmem:[#allocation7 + $0x370] ss:$8 sps:$4 sm:$0xff]  }
 0x285   :  { %1669 = vmatpush1.bf16.msra.mxu1 %v3503_v6  ;;  %v3682_v6 = vld [vmem:[#allocation7 + $0x784] ss:$8 sps:$4 sm:$0xff]  }
 0x286   :  { %1670 = vmatprep.subr.bf16.mxu1 %v3508_v7  ;;  %v3584_v7 = vld [vmem:[#allocation7 + $0x380] ss:$8 sps:$4 sm:$0xff]  }
 0x289   :  { %1671 = vmatpush1.bf16.msra.mxu1 %v3506_v8  ;;  %v3680_v8 = vld [vmem:[#allocation7 + $0x780] ss:$8 sps:$4 sm:$0xff]  }
 0x28a   :  { %1672 = vmatprep.subr.bf16.mxu1 %v3511_v9  ;;  %v3685_v9 = vld [vmem:[#allocation7 + $0x794] ss:$8 sps:$4 sm:$0xff]  }
 0x28d   :  { %1673 = vmatpush1.bf16.msra.mxu1 %v3509_v11  ;;  %v3592_v11 = vld [vmem:[#allocation7 + $0x3a4] ss:$8 sps:$4 sm:$0xff]  }
 0x28e   :  { %2163 = vmatprep.subr.bf16.mxu1 %v3658_v28  ;;  %v3700_v28 = vld [vmem:[#allocation7 + $0x7e4] ss:$8 sps:$4 sm:$0xff]  }
 0x290   :  { %1675 = vmatmul.mubr.bf16.vlgmr.msra.gmra.mrb[8].mxu1 %v1472_v13  ;;  %v3688_v13 = vld [vmem:[#allocation7 + $0x7a4] ss:$8 sps:$4 sm:$0xff]  }
 0x291   :  { %2164 = vmatpush1.bf16.msra.mxu1 %v3656_v27  ;;  %v947_v27 = vrot.slane %v4154_v37, %v4142_v32 }
 0x292   :  { %2165 = vmatprep.subr.bf16.mxu1 %v3661_v30 }
 0x295   :  { %2166 = vmatpush1.bf16.msra.mxu1 %v3659_v53 }
 0x296   :  { %2167 = vmatprep.subr.bf16.mxu1 %v3664_v34 }
 0x299   :  { %2168 = vmatpush1.bf16.msra.mxu1 %v3662_v42 }
 0x29a   :  { %2169 = vmatprep.subr.bf16.mxu1 %v3667_v44 }
 0x29d   :  { %2170 = vmatpush1.bf16.msra.mxu1 %v3665_v49  ;;  %v3610_v49 = vld [vmem:[#allocation7 + $0x504] ss:$8 sps:$4 sm:$0xff]  }
 0x29e   :  { %2171 = vmatprep.subr.bf16.mxu1 %v3670_v50 }
 0x2a1   :  { %2172 = vmatpush1.bf16.msra.mxu1 %v3668_v54  ;;  %v3608_v54 = vld [vmem:[#allocation7 + $0x500] ss:$8 sps:$4 sm:$0xff]  }
 0x2a2   :  { %2173 = vmatprep.subr.bf16.mxu1 %v3673_v55 }
 0x2a5   :  { %2174 = vmatpush1.bf16.msra.mxu1 %v3671_v58  ;;  %v3616_v58 = vld [vmem:[#allocation7 + $0x524] ss:$8 sps:$4 sm:$0xff]  }
 0x2a6   :  { %2175 = vmatprep.subr.bf16.mxu1 %v3676_v60  ;;  %v3614_v60 = vld [vmem:[#allocation7 + $0x520] ss:$8 sps:$4 sm:$0xff]  }
 0x2a9   :  { %2176 = vmatpush1.bf16.msra.mxu1 %v3674_v1  ;;  %v3622_v1 = vld [vmem:[#allocation7 + $0x544] ss:$8 sps:$4 sm:$0xff]  }
 0x2aa   :  { %2177 = vmatprep.subr.bf16.mxu1 %v3679_v2  ;;  %v3620_v2 = vld [vmem:[#allocation7 + $0x540] ss:$8 sps:$4 sm:$0xff]  }
 0x2ad   :  { %2178 = vmatpush1.bf16.msra.mxu1 %v3677_v5  ;;  %v3628_v5 = vld [vmem:[#allocation7 + $0x564] ss:$8 sps:$4 sm:$0xff]  }
 0x2ae   :  { %2179 = vmatprep.subr.bf16.mxu1 %v3682_v6  ;;  %v3626_v6 = vld [vmem:[#allocation7 + $0x560] ss:$8 sps:$4 sm:$0xff]  }
 0x2b1   :  { %2180 = vmatpush1.bf16.msra.mxu1 %v3680_v8  ;;  %v3701_v8 = vld [vmem:[#allocation7 + $0x7f0] ss:$8 sps:$4 sm:$0xff]  }
 0x2b2   :  { %2181 = vmatprep.subr.bf16.mxu1 %v3685_v9  ;;  %v3629_v9 = vld [vmem:[#allocation7 + $0x570] ss:$8 sps:$4 sm:$0xff]  }
 0x2b5   :  { %2182 = vmatpush1.bf16.msra.mxu1 %v3683_v12  ;;  %v3637_v12 = vld [vmem:[#allocation7 + $0x594] ss:$8 sps:$4 sm:$0xff]  }
 0x2b6   :  { %2183 = vmatprep.subr.bf16.mxu1 %v3688_v13  ;;  %v3635_v13 = vld [vmem:[#allocation7 + $0x590] ss:$8 sps:$4 sm:$0xff]  }
 0x2e3   :  { %v607_v15 = vpop.f32.mrb[0].mxu1 }
 0x2e4   :  { %v608_v16 = vadd.f32 %v607_v15, %v408_v61  ;;  %v609_v17 = vpop.f32.mrb[1].mxu1  ;;  %v3590_v61 = vld [vmem:[#allocation7 + $0x3a0] ss:$8 sps:$4 sm:$0xff]  }
 0x2e5   :  { %v610_v36 = vadd.f32 %v609_v17, %v412_v14  ;;  %v611_v18 = vpop.f32.mrb[2].mxu1  ;;  %v3595_v14 = vld [vmem:[#allocation7 + $0x3b4] ss:$8 sps:$4 sm:$0xff]   ;;  %v3686_v15 = vld [vmem:[#allocation7 + $0x7a0] ss:$8 sps:$4 sm:$0xff]  }
 0x2e6   :  { %vm614_vm3 = vcmp.ge.f32.partialorder %v608_v16, 0.0  ;;  %v616_v19 = vmul.f32 0.01, %v608_v16  ;;  %v612_v20 = vpop.f32.mrb[3].mxu1  ;;  %v3593_v17 = vld [vmem:[#allocation7 + $0x3b0] ss:$8 sps:$4 sm:$0xff]   ;;  %2184 = vmatpush1.bf16.msra.mxu1 %v3686_v15 }
 0x2e7   :  { %vm615_vm4 = vcmp.ge.f32.partialorder %v610_v36, 0.0  ;;  %v617_v21 = vmul.f32 0.01, %v610_v36  ;;  %v3689_v18 = vld [vmem:[#allocation7 + $0x7b0] ss:$8 sps:$4 sm:$0xff]  }
 0x2e8   :  { %v618_v22 = vsel %vm614_vm3, %v608_v16, %v616_v19  ;;  %v3691_v16 = vld [vmem:[#allocation7 + $0x7b4] ss:$8 sps:$4 sm:$0xff]   ;;  %v3694_v19 = vld [vmem:[#allocation7 + $0x7c4] ss:$8 sps:$4 sm:$0xff]   ;;  %v3596_v20 = vld [vmem:[#allocation7 + $0x3c0] ss:$8 sps:$4 sm:$0xff]  }
 0x2e9   :  { %v619_v23 = vsel %vm615_vm4, %v610_v36, %v617_v21  ;;  %v653_v25 = vpack.c.bf16 %v618_v22, %v618_v22  ;;  %v3598_v36 = vld [vmem:[#allocation7 + $0x3c4] ss:$8 sps:$4 sm:$0xff]   ;;  %2185 = vmatprep.subr.bf16.mxu1 %v3691_v16  ;;  %v3601_v21 = vld [vmem:[#allocation7 + $0x3d4] ss:$8 sps:$4 sm:$0xff]   ;;  %v3692_v22 = vld [vmem:[#allocation7 + $0x7c0] ss:$8 sps:$4 sm:$0xff]  }
 0x2ea   :  { %v654_v24 = vpack.c.bf16 %v619_v23, %v619_v23  ;;  %2186 = vmatpush1.bf16.msra.mxu1 %v3689_v18  ;;  %v3697_v23 = vld [vmem:[#allocation7 + $0x7d4] ss:$8 sps:$4 sm:$0xff]   ;;  %v3641_v16 = vld [vmem:[#allocation7 + $0x5b0] ss:$8 sps:$4 sm:$0xff]  }
 0x2eb   :  { %2187 = vmatprep.subr.bf16.mxu1 %v3694_v19  ;;  %v3643_v15 = vld [vmem:[#allocation7 + $0x5b4] ss:$8 sps:$4 sm:$0xff]   ;;  %v4200_v19 = vsub.s32 7, %v4110_v39 }
 0x2ec   :  { %855 = vmatprep.mubr.bf16.mxu0 %v654_v24  ;;  %v3599_v24 = vld [vmem:[#allocation7 + $0x3d0] ss:$8 sps:$4 sm:$0xff]   ;;  %v3649_v18 = vld [vmem:[#allocation7 + $0x5d4] ss:$8 sps:$4 sm:$0xff]  }
 0x2ed   :  { %856 = vmatmul.mubr.bf16.vlgmr.msra.gmra.mrb[4].mxu0 %v653_v25  ;;  %v943_v25 = vrot.slane %v4159_v41, %v4142_v32 }
 0x2ee   :  { %1359 = vmatpush1.bf16.msra.mxu0 %v3560_v63  ;;  %v3604_v63 = vld [vmem:[#allocation7 + $0x3e4] ss:$8 sps:$4 sm:$0xff]   ;;  %2188 = vmatpush1.bf16.msra.mxu1 %v3692_v22  ;;  %v1477_v22 = vrot.slane %v4159_v41, %v4200_v19 }
 0x2ef   :  { %1360 = vmatprep.subr.bf16.mxu0 %v3565_v26  ;;  %v3695_v26 = vld [vmem:[#allocation7 + $0x7d0] ss:$8 sps:$4 sm:$0xff]   ;;  %2189 = vmatprep.subr.bf16.mxu1 %v3697_v23  ;;  %v1481_v23 = vrot.slane %v4154_v37, %v4200_v19  ;;  %v3706_v41 = vld [vmem:[#allocation7 + $0x604] ss:$8 sps:$4 sm:$0xff]  }
 0x2f2   :  { %1361 = vmatpush1.bf16.msra.mxu0 %v3563_v29  ;;  %v3602_v29 = vld [vmem:[#allocation7 + $0x3e0] ss:$8 sps:$4 sm:$0xff]   ;;  %2190 = vmatpush1.bf16.msra.mxu1 %v3695_v26 }
 0x2f3   :  { %1362 = vmatprep.subr.bf16.mxu0 %v3568_v31  ;;  %v3607_v31 = vld [vmem:[#allocation7 + $0x3f4] ss:$8 sps:$4 sm:$0xff]   ;;  %2191 = vmatprep.subr.bf16.mxu1 %v3700_v28 }
 0x2f6   :  { %1363 = vmatpush1.bf16.msra.mxu0 %v3566_v38  ;;  %v3698_v38 = vld [vmem:[#allocation7 + $0x7e0] ss:$8 sps:$4 sm:$0xff]  }
 0x2f7   :  { %1364 = vmatprep.subr.bf16.mxu0 %v3571_v40  ;;  %2192 = vmatpush1.bf16.msra.mxu1 %v3698_v38 }
 0x2fa   :  { %1365 = vmatpush1.bf16.msra.mxu0 %v3569_v47 }
 0x2fb   :  { %1366 = vmatprep.subr.bf16.mxu0 %v3574_v48  ;;  %v3605_v48 = vld [vmem:[#allocation7 + $0x3f0] ss:$8 sps:$4 sm:$0xff]  }
 0x2fe   :  { %1367 = vmatpush1.bf16.msra.mxu0 %v3572_v51 }
 0x2ff   :  { %1368 = vmatprep.subr.bf16.mxu0 %v3577_v52 }
 0x302   :  { %1369 = vmatpush1.bf16.msra.mxu0 %v3575_v56  ;;  %v3613_v56 = vld [vmem:[#allocation7 + $0x514] ss:$8 sps:$4 sm:$0xff]  }
 0x303   :  { %1370 = vmatprep.subr.bf16.mxu0 %v3580_v57  ;;  %v3611_v57 = vld [vmem:[#allocation7 + $0x510] ss:$8 sps:$4 sm:$0xff]  }
 0x306   :  { %1371 = vmatpush1.bf16.msra.mxu0 %v3578_v62  ;;  %v3619_v62 = vld [vmem:[#allocation7 + $0x534] ss:$8 sps:$4 sm:$0xff]  }
 0x307   :  { %1372 = vmatprep.subr.bf16.mxu0 %v3583_v0  ;;  %v3617_v0 = vld [vmem:[#allocation7 + $0x530] ss:$8 sps:$4 sm:$0xff]  }
 0x30a   :  { %1373 = vmatpush1.bf16.msra.mxu0 %v3581_v3  ;;  %v3625_v3 = vld [vmem:[#allocation7 + $0x554] ss:$8 sps:$4 sm:$0xff]  }
 0x30b   :  { %1374 = vmatprep.subr.bf16.mxu0 %v3586_v4  ;;  %v3623_v4 = vld [vmem:[#allocation7 + $0x550] ss:$8 sps:$4 sm:$0xff]  }
 0x30e   :  { %1375 = vmatpush1.bf16.msra.mxu0 %v3584_v7  ;;  %v3703_v7 = vld [vmem:[#allocation7 + $0x7f4] ss:$8 sps:$4 sm:$0xff]  }
 0x30f   :  { %1376 = vmatprep.subr.bf16.mxu0 %v3589_v33  ;;  %v3631_v33 = vld [vmem:[#allocation7 + $0x574] ss:$8 sps:$4 sm:$0xff]   ;;  %2193 = vmatprep.subr.bf16.mxu1 %v3703_v7 }
 0x310   :  { %2194 = vmatpush1.bf16.msra.mxu1 %v3701_v8  ;;  %v3739_v7 = vld [vmem:[#allocation7 + $0x6b4] ss:$8 sps:$4 sm:$0xff]   ;;  %v3742_v8 = vld [vmem:[#allocation7 + $0x6c4] ss:$8 sps:$4 sm:$0xff]  }
 0x312   :  { %1377 = vmatpush1.bf16.msra.mxu0 %v3587_v10  ;;  %v3634_v10 = vld [vmem:[#allocation7 + $0x584] ss:$8 sps:$4 sm:$0xff]  }
 0x313   :  { %1378 = vmatprep.subr.bf16.mxu0 %v3592_v11  ;;  %v3632_v11 = vld [vmem:[#allocation7 + $0x580] ss:$8 sps:$4 sm:$0xff]  }
 0x316   :  { %1379 = vmatpush1.bf16.msra.mxu0 %v3590_v61  ;;  %v3640_v61 = vld [vmem:[#allocation7 + $0x5a4] ss:$8 sps:$4 sm:$0xff]  }
 0x317   :  { %1380 = vmatprep.subr.bf16.mxu0 %v3595_v14  ;;  %v3638_v14 = vld [vmem:[#allocation7 + $0x5a0] ss:$8 sps:$4 sm:$0xff]  }
 0x31a   :  { %1381 = vmatpush1.bf16.msra.mxu0 %v3593_v17  ;;  %v3646_v17 = vld [vmem:[#allocation7 + $0x5c4] ss:$8 sps:$4 sm:$0xff]  }
 0x31b   :  { %1382 = vmatprep.subr.bf16.mxu0 %v3598_v36  ;;  %v3644_v36 = vld [vmem:[#allocation7 + $0x5c0] ss:$8 sps:$4 sm:$0xff]  }
 0x31e   :  { %1383 = vmatpush1.bf16.msra.mxu0 %v3596_v20  ;;  %v3647_v20 = vld [vmem:[#allocation7 + $0x5d0] ss:$8 sps:$4 sm:$0xff]  }
 0x31f   :  { %1384 = vmatprep.subr.bf16.mxu0 %v3601_v21  ;;  %v3652_v21 = vld [vmem:[#allocation7 + $0x5e4] ss:$8 sps:$4 sm:$0xff]  }
 0x322   :  { %1385 = vmatpush1.bf16.msra.mxu0 %v3599_v24  ;;  %v3650_v24 = vld [vmem:[#allocation7 + $0x5e0] ss:$8 sps:$4 sm:$0xff]  }
 0x323   :  { %v1142_v30 = vpop.f32.mrb[4].mxu1  ;;  %1386 = vmatprep.subr.bf16.mxu0 %v3604_v63 }
 0x324   :  { %v1143_v53 = vadd.f32 %v1142_v30, %v943_v25  ;;  %v1144_v34 = vpop.f32.mrb[5].mxu1  ;;  %v3655_v25 = vld [vmem:[#allocation7 + $0x5f4] ss:$8 sps:$4 sm:$0xff]  }
 0x325   :  { %v1145_v40 = vadd.f32 %v1144_v34, %v947_v27  ;;  %v1146_v42 = vpop.f32.mrb[6].mxu1 }
 0x326   :  { %vm1149_vm5 = vcmp.ge.f32.partialorder %v1143_v53, 0.0  ;;  %v1151_v44 = vmul.f32 0.01, %v1143_v53  ;;  %v1147_v47 = vpop.f32.mrb[7].mxu1  ;;  %1387 = vmatpush1.bf16.msra.mxu0 %v3602_v29  ;;  %v3704_v42 = vld [vmem:[#allocation7 + $0x600] ss:$8 sps:$4 sm:$0xff]  }
 0x327   :  { %vm1150_vm6 = vcmp.ge.f32.partialorder %v1145_v40, 0.0  ;;  %v1152_v32 = vmul.f32 0.01, %v1145_v40  ;;  %1388 = vmatprep.subr.bf16.mxu0 %v3607_v31  ;;  %v3709_v47 = vld [vmem:[#allocation7 + $0x614] ss:$8 sps:$4 sm:$0xff]  }
 0x328   :  { %v1153_v50 = vsel %vm1149_vm5, %v1143_v53, %v1151_v44  ;;  %v3653_v53 = vld [vmem:[#allocation7 + $0x5f0] ss:$8 sps:$4 sm:$0xff]  }
 0x329   :  { %v1154_v51 = vsel %vm1150_vm6, %v1145_v40, %v1152_v32  ;;  %v1188_v55 = vpack.c.bf16 %v1153_v50, %v1153_v50  ;;  %v3712_v32 = vld [vmem:[#allocation7 + $0x624] ss:$8 sps:$4 sm:$0xff]   ;;  %v3715_v50 = vld [vmem:[#allocation7 + $0x634] ss:$8 sps:$4 sm:$0xff]  }
 0x32a   :  { %1389 = vmatpush1.bf16.msra.mxu0 %v3605_v48  ;;  %v1189_v52 = vpack.c.bf16 %v1154_v51, %v1154_v51  ;;  %v3707_v48 = vld [vmem:[#allocation7 + $0x610] ss:$8 sps:$4 sm:$0xff]  }
 0x32b   :  { %1892 = vmatprep.subr.bf16.mxu0 %v3610_v49  ;;  %v3710_v49 = vld [vmem:[#allocation7 + $0x620] ss:$8 sps:$4 sm:$0xff]   ;;  %v3713_v51 = vld [vmem:[#allocation7 + $0x630] ss:$8 sps:$4 sm:$0xff]  }
 0x32c   :  { %1390 = vmatprep.mubr.bf16.mxu0 %v1189_v52  ;;  %v3718_v52 = vld [vmem:[#allocation7 + $0x644] ss:$8 sps:$4 sm:$0xff]  }
 0x32d   :  { %1391 = vmatmul.mubr.bf16.vlgmr.msra.gmra.mrb[8].mxu0 %v1188_v55  ;;  %v3721_v55 = vld [vmem:[#allocation7 + $0x654] ss:$8 sps:$4 sm:$0xff]  }
 0x32e   :  { %1893 = vmatpush1.bf16.msra.mxu0 %v3608_v54  ;;  %v3716_v54 = vld [vmem:[#allocation7 + $0x640] ss:$8 sps:$4 sm:$0xff]  }
 0x32f   :  { %1894 = vmatprep.subr.bf16.mxu0 %v3613_v56  ;;  %v3719_v56 = vld [vmem:[#allocation7 + $0x650] ss:$8 sps:$4 sm:$0xff]  }
 0x332   :  { %1895 = vmatpush1.bf16.msra.mxu0 %v3611_v57  ;;  %v3724_v57 = vld [vmem:[#allocation7 + $0x664] ss:$8 sps:$4 sm:$0xff]  }
 0x333   :  { %1896 = vmatprep.subr.bf16.mxu0 %v3616_v58  ;;  %v3722_v58 = vld [vmem:[#allocation7 + $0x660] ss:$8 sps:$4 sm:$0xff]  }
 0x336   :  { %1897 = vmatpush1.bf16.msra.mxu0 %v3614_v60  ;;  %v3727_v60 = vld [vmem:[#allocation7 + $0x674] ss:$8 sps:$4 sm:$0xff]  }
 0x337   :  { %1898 = vmatprep.subr.bf16.mxu0 %v3619_v62  ;;  %v3754_v62 = vld [vmem:[#allocation7 + $0x804] ss:$8 sps:$4 sm:$0xff]  }
 0x338   :  { %2600 = vmatprep.subr.bf16.mxu1 %v3754_v62  ;;  %v3793_v62 = vld [vmem:[#allocation7 + $0x8d4] ss:$8 sps:$4 sm:$0xff]  }
 0x33a   :  { %1899 = vmatpush1.bf16.msra.mxu0 %v3617_v0  ;;  %v3725_v0 = vld [vmem:[#allocation7 + $0x670] ss:$8 sps:$4 sm:$0xff]  }
 0x33b   :  { %1900 = vmatprep.subr.bf16.mxu0 %v3622_v1  ;;  %v3730_v1 = vld [vmem:[#allocation7 + $0x684] ss:$8 sps:$4 sm:$0xff]  }
 0x33e   :  { %1901 = vmatpush1.bf16.msra.mxu0 %v3620_v2  ;;  %v3728_v2 = vld [vmem:[#allocation7 + $0x680] ss:$8 sps:$4 sm:$0xff]  }
 0x33f   :  { %1902 = vmatprep.subr.bf16.mxu0 %v3625_v3  ;;  %v3733_v3 = vld [vmem:[#allocation7 + $0x694] ss:$8 sps:$4 sm:$0xff]  }
 0x342   :  { %1903 = vmatpush1.bf16.msra.mxu0 %v3623_v4  ;;  %v3731_v4 = vld [vmem:[#allocation7 + $0x690] ss:$8 sps:$4 sm:$0xff]  }
 0x343   :  { %1904 = vmatprep.subr.bf16.mxu0 %v3628_v5  ;;  %v3736_v5 = vld [vmem:[#allocation7 + $0x6a4] ss:$8 sps:$4 sm:$0xff]  }
 0x346   :  { %1905 = vmatpush1.bf16.msra.mxu0 %v3626_v6  ;;  %v3734_v6 = vld [vmem:[#allocation7 + $0x6a0] ss:$8 sps:$4 sm:$0xff]  }
 0x347   :  { %1906 = vmatprep.subr.bf16.mxu0 %v3631_v33  ;;  %v3737_v33 = vld [vmem:[#allocation7 + $0x6b0] ss:$8 sps:$4 sm:$0xff]  }
 0x34a   :  { %1907 = vmatpush1.bf16.msra.mxu0 %v3629_v9  ;;  %v3740_v9 = vld [vmem:[#allocation7 + $0x6c0] ss:$8 sps:$4 sm:$0xff]  }
 0x34b   :  { %1908 = vmatprep.subr.bf16.mxu0 %v3634_v10  ;;  %v3745_v10 = vld [vmem:[#allocation7 + $0x6d4] ss:$8 sps:$4 sm:$0xff]  }
 0x34e   :  { %1909 = vmatpush1.bf16.msra.mxu0 %v3632_v11  ;;  %v3743_v11 = vld [vmem:[#allocation7 + $0x6d0] ss:$8 sps:$4 sm:$0xff]  }
 0x34f   :  { %1910 = vmatprep.subr.bf16.mxu0 %v3637_v12  ;;  %v3748_v12 = vld [vmem:[#allocation7 + $0x6e4] ss:$8 sps:$4 sm:$0xff]  }
 0x352   :  { %1911 = vmatpush1.bf16.msra.mxu0 %v3635_v13  ;;  %v3746_v13 = vld [vmem:[#allocation7 + $0x6e0] ss:$8 sps:$4 sm:$0xff]  }
 0x353   :  { %1912 = vmatprep.subr.bf16.mxu0 %v3640_v61  ;;  %v3751_v61 = vld [vmem:[#allocation7 + $0x6f4] ss:$8 sps:$4 sm:$0xff]  }
 0x356   :  { %1913 = vmatpush1.bf16.msra.mxu0 %v3638_v14  ;;  %v3749_v14 = vld [vmem:[#allocation7 + $0x6f0] ss:$8 sps:$4 sm:$0xff]  }
 0x357   :  { %1914 = vmatprep.subr.bf16.mxu0 %v3643_v15  ;;  %v4207_v15 = vsub.s32 2, %v4110_v39 }
 0x35a   :  { %1915 = vmatpush1.bf16.msra.mxu0 %v3641_v16  ;;  %v4209_v16 = vld [vmem:[#allocation8] sm:$0xff] }
 0x35b   :  { %1916 = vmatprep.subr.bf16.mxu0 %v3646_v17  ;;  %v658_v17 = vrot.slane %v4209_v16, %v4207_v15 }
 0x35e   :  { %1917 = vmatpush1.bf16.msra.mxu0 %v3644_v36  ;;  %v4213_v36 = vld [vmem:[#allocation8 + $0x8] sm:$0xff] }
 0x35f   :  { %1918 = vmatprep.subr.bf16.mxu0 %v3649_v18  ;;  %v662_v18 = vrot.slane %v4213_v36, %v4207_v15 }
 0x362   :  { %1919 = vmatpush1.bf16.msra.mxu0 %v3647_v20 }
 0x363   :  { %v1676_v63 = vpop.f32.mrb[8].mxu1  ;;  %1920 = vmatprep.subr.bf16.mxu0 %v3652_v21 }
 0x364   :  { %v1677_v26 = vadd.f32 %v1676_v63, %v1477_v22  ;;  %v1678_v27 = vpop.f32.mrb[9].mxu1 }
 0x365   :  { %v1679_v28 = vadd.f32 %v1678_v27, %v1481_v23  ;;  %v1680_v29 = vpop.f32.mrb[10].mxu1  ;;  %v3757_v27 = vld [vmem:[#allocation7 + $0x814] ss:$8 sps:$4 sm:$0xff]  }
 0x366   :  { %vm1683_vm7 = vcmp.ge.f32.partialorder %v1677_v26, 0.0  ;;  %v1685_v30 = vmul.f32 0.01, %v1677_v26  ;;  %v1681_v31 = vpop.f32.mrb[11].mxu1  ;;  %1921 = vmatpush1.bf16.msra.mxu0 %v3650_v24  ;;  %v3990_v29 = vmov 2  }
 0x367   :  { %vm1684_vm8 = vcmp.ge.f32.partialorder %v1679_v28, 0.0  ;;  %v1686_v34 = vmul.f32 0.01, %v1679_v28  ;;  %1922 = vmatprep.subr.bf16.mxu0 %v3655_v25  ;;  %3342 = vset.pattern.permute.xlu1 %v3990_v29  ;;  %v3854_v31 = vld [vmem:[%s4251_s0] sm:$0xff] }
 0x368   :  { %v1687_v38 = vsel %vm1683_vm7, %v1677_v26, %v1685_v30  ;;  %v3752_v26 = vld [vmem:[#allocation7 + $0x800] ss:$8 sps:$4 sm:$0xff]   ;;  %v3760_v30 = vld [vmem:[#allocation7 + $0x824] ss:$8 sps:$4 sm:$0xff]   ;;  %2644 = vperm.xlu1 %3342, %v3854_v31   ;;  %3343 = vset.pattern.permute.xlu0 %v3990_v29  ;;  %v3809_v29 = vld [vmem:[#allocation7 + $0x930] ss:$8 sps:$4 sm:$0xff]  }
 0x369   :  { %v1688_v37 = vsel %vm1684_vm8, %v1679_v28, %v1686_v34  ;;  %v1722_v44 = vpack.c.bf16 %v1687_v38, %v1687_v38  ;;  %v3755_v28 = vld [vmem:[#allocation7 + $0x810] ss:$8 sps:$4 sm:$0xff]   ;;  %v3763_v34 = vld [vmem:[#allocation7 + $0x834] ss:$8 sps:$4 sm:$0xff]   ;;  %v3766_v38 = vld [vmem:[#allocation7 + $0x844] ss:$8 sps:$4 sm:$0xff]  }
 0x36a   :  { %1923 = vmatpush1.bf16.msra.mxu0 %v3653_v53  ;;  %v1723_v40 = vpack.c.bf16 %v1688_v37, %v1688_v37  ;;  %v3758_v53 = vld [vmem:[#allocation7 + $0x820] ss:$8 sps:$4 sm:$0xff]  }
 0x36b   :  { %2364 = vmatprep.subr.bf16.mxu0 %v3706_v41  ;;  %v3761_v41 = vld [vmem:[#allocation7 + $0x830] ss:$8 sps:$4 sm:$0xff]   ;;  %v3764_v37 = vld [vmem:[#allocation7 + $0x840] ss:$8 sps:$4 sm:$0xff]  }
 0x36c   :  { %1924 = vmatprep.mubr.bf16.mxu0 %v1723_v40  ;;  %v3769_v40 = vld [vmem:[#allocation7 + $0x854] ss:$8 sps:$4 sm:$0xff]   ;;  %v3812_v31 = vld [vmem:[#allocation7 + $0x940] ss:$8 sps:$4 sm:$0xff]  }
 0x36d   :  { %1925 = vmatmul.mubr.bf16.vlgmr.msra.gmra.mrb[12].mxu0 %v1722_v44  ;;  %v3772_v44 = vld [vmem:[#allocation7 + $0x864] ss:$8 sps:$4 sm:$0xff]  }
 0x36e   :  { %2365 = vmatpush1.bf16.msra.mxu0 %v3704_v42  ;;  %v3767_v42 = vld [vmem:[#allocation7 + $0x850] ss:$8 sps:$4 sm:$0xff]  }
 0x36f   :  { %2366 = vmatprep.subr.bf16.mxu0 %v3709_v47  ;;  %v3770_v47 = vld [vmem:[#allocation7 + $0x860] ss:$8 sps:$4 sm:$0xff]  }
 0x372   :  { %2367 = vmatpush1.bf16.msra.mxu0 %v3707_v48  ;;  %v3775_v48 = vld [vmem:[#allocation7 + $0x874] ss:$8 sps:$4 sm:$0xff]  }
 0x373   :  { %2368 = vmatprep.subr.bf16.mxu0 %v3712_v32  ;;  %v3773_v32 = vld [vmem:[#allocation7 + $0x870] ss:$8 sps:$4 sm:$0xff]  }
 0x376   :  { %2369 = vmatpush1.bf16.msra.mxu0 %v3710_v49  ;;  %v3778_v49 = vld [vmem:[#allocation7 + $0x884] ss:$8 sps:$4 sm:$0xff]  }
 0x377   :  { %2370 = vmatprep.subr.bf16.mxu0 %v3715_v50  ;;  %v3776_v50 = vld [vmem:[#allocation7 + $0x880] ss:$8 sps:$4 sm:$0xff]  }
 0x37a   :  { %2371 = vmatpush1.bf16.msra.mxu0 %v3713_v51  ;;  %v3781_v51 = vld [vmem:[#allocation7 + $0x894] ss:$8 sps:$4 sm:$0xff]  }
 0x37b   :  { %2372 = vmatprep.subr.bf16.mxu0 %v3718_v52  ;;  %v3779_v52 = vld [vmem:[#allocation7 + $0x890] ss:$8 sps:$4 sm:$0xff]  }
 0x37e   :  { %2373 = vmatpush1.bf16.msra.mxu0 %v3716_v54  ;;  %v3784_v54 = vld [vmem:[#allocation7 + $0x8a4] ss:$8 sps:$4 sm:$0xff]  }
 0x37f   :  { %2374 = vmatprep.subr.bf16.mxu0 %v3721_v55  ;;  %v3782_v55 = vld [vmem:[#allocation7 + $0x8a0] ss:$8 sps:$4 sm:$0xff]  }
 0x382   :  { %2375 = vmatpush1.bf16.msra.mxu0 %v3719_v56  ;;  %v3787_v56 = vld [vmem:[#allocation7 + $0x8b4] ss:$8 sps:$4 sm:$0xff]  }
 0x383   :  { %2376 = vmatprep.subr.bf16.mxu0 %v3724_v57  ;;  %v3785_v57 = vld [vmem:[#allocation7 + $0x8b0] ss:$8 sps:$4 sm:$0xff]  }
 0x386   :  { %2377 = vmatpush1.bf16.msra.mxu0 %v3722_v58  ;;  %v3790_v58 = vld [vmem:[#allocation7 + $0x8c4] ss:$8 sps:$4 sm:$0xff]  }
 0x387   :  { %2378 = vmatprep.subr.bf16.mxu0 %v3727_v60  ;;  %v3788_v60 = vld [vmem:[#allocation7 + $0x8c0] ss:$8 sps:$4 sm:$0xff]  }
 0x38a   :  { %2379 = vmatpush1.bf16.msra.mxu0 %v3725_v0  ;;  %v3791_v0 = vld [vmem:[#allocation7 + $0x8d0] ss:$8 sps:$4 sm:$0xff]  }
 0x38b   :  { %2380 = vmatprep.subr.bf16.mxu0 %v3730_v1  ;;  %v3796_v1 = vld [vmem:[#allocation7 + $0x8e4] ss:$8 sps:$4 sm:$0xff]  }
 0x38e   :  { %2381 = vmatpush1.bf16.msra.mxu0 %v3728_v2  ;;  %v3794_v2 = vld [vmem:[#allocation7 + $0x8e0] ss:$8 sps:$4 sm:$0xff]  }
 0x38f   :  { %2382 = vmatprep.subr.bf16.mxu0 %v3733_v3  ;;  %v1193_v3 = vrot.slane %v4209_v16, %v4166_v46 }
 0x392   :  { %2383 = vmatpush1.bf16.msra.mxu0 %v3731_v4  ;;  %v3799_v4 = vld [vmem:[#allocation7 + $0x8f4] ss:$8 sps:$4 sm:$0xff]  }
 0x393   :  { %2384 = vmatprep.subr.bf16.mxu0 %v3736_v5  ;;  %v1197_v5 = vrot.slane %v4213_v36, %v4166_v46 }
 0x396   :  { %2385 = vmatpush1.bf16.msra.mxu0 %v3734_v6 }
 0x397   :  { %2386 = vmatprep.subr.bf16.mxu0 %v3739_v7  ;;  %v3797_v7 = vld [vmem:[#allocation7 + $0x8f0] ss:$8 sps:$4 sm:$0xff]  }
 0x39a   :  { %2387 = vmatpush1.bf16.msra.mxu0 %v3737_v33 }
 0x39b   :  { %2388 = vmatprep.subr.bf16.mxu0 %v3742_v8 }
 0x39e   :  { %2389 = vmatpush1.bf16.msra.mxu0 %v3740_v9 }
 0x39f   :  { %2390 = vmatprep.subr.bf16.mxu0 %v3745_v10 }
 0x3a2   :  { %2391 = vmatpush1.bf16.msra.mxu0 %v3743_v11 }
 0x3a3   :  { %2392 = vmatprep.subr.bf16.mxu0 %v3748_v12 }
 0x3a6   :  { %2393 = vmatpush1.bf16.msra.mxu0 %v3746_v13 }
 0x3a7   :  { %2394 = vmatprep.subr.bf16.mxu0 %v3751_v61  ;;  %v4224_v61 = vld [vmem:[#allocation8 + $0x10] sm:$0x7] }
 0x3a8   :  { %v1727_v46 = vrot.slane %v4224_v61, %v4113_v43 }
 0x3aa   :  { %2395 = vmatpush1.bf16.msra.mxu0 %v3749_v14  ;;  %v4226_v14 = vld [vmem:[#allocation8 + $0x18] sm:$0x7] }
 0x3ab   :  { %v1731_v16 = vrot.slane %v4226_v14, %v4113_v43  ;;  %v3806_v43 = vld [vmem:[#allocation7 + $0x920] ss:$8 sps:$4 sm:$0xff]  }
 0x3c0   :  { %v857_v20 = vpop.f32.mrb[4].mxu0 }
 0x3c1   :  { %v858_v21 = vadd.f32 %v857_v20, %v658_v17  ;;  %v859_v22 = vpop.f32.mrb[5].mxu0 }
 0x3c2   :  { %v860_v23 = vadd.f32 %v859_v22, %v662_v18  ;;  %v861_v24 = vpop.f32.mrb[6].mxu0 }
 0x3c3   :  { %v862_v63 = vpop.f32.mrb[7].mxu0  ;;  %v2001_v39 = vpack.c.bf16 %v858_v21, %v858_v21 }
 0x3c4   :  { %v2002_v25 = vpack.c.bf16 %v860_v23, %v860_v23  ;;  %v3800_v63 = vld [vmem:[#allocation7 + $0x900] ss:$8 sps:$4 sm:$0xff]  }
 0x3c6   :  { %2195 = vmatprep.mubr.bf16.mxu1 %v2002_v25  ;;  %v3802_v25 = vld [vmem:[#allocation7 + $0x904] ss:$8 sps:$4 sm:$0xff]  }
 0x3c7   :  { %2196 = vmatmul.mubr.bf16.vlgmr.msra.gmra.mrb[12].mxu1 %v2001_v39  ;;  %2888 = vmatprep.subr.bf16.mxu0 %v3802_v25  ;;  %v3803_v39 = vld [vmem:[#allocation7 + $0x910] ss:$8 sps:$4 sm:$0xff]  }
 0x3c8   :  { %2601 = vmatpush1.bf16.msra.mxu1 %v3752_v26  ;;  %v3805_v26 = vld [vmem:[#allocation7 + $0x914] ss:$8 sps:$4 sm:$0xff]  }
 0x3c9   :  { %2602 = vmatprep.subr.bf16.mxu1 %v3757_v27  ;;  %v3808_v27 = vld [vmem:[#allocation7 + $0x924] ss:$8 sps:$4 sm:$0xff]  }
 0x3cc   :  { %2603 = vmatpush1.bf16.msra.mxu1 %v3755_v28  ;;  %v3811_v28 = vld [vmem:[#allocation7 + $0x934] ss:$8 sps:$4 sm:$0xff]  }
 0x3cd   :  { %2604 = vmatprep.subr.bf16.mxu1 %v3760_v30  ;;  %v3814_v30 = vld [vmem:[#allocation7 + $0x944] ss:$8 sps:$4 sm:$0xff]  }
 0x3d0   :  { %2605 = vmatpush1.bf16.msra.mxu1 %v3758_v53  ;;  %v3817_v53 = vld [vmem:[#allocation7 + $0x954] ss:$8 sps:$4 sm:$0xff]  }
 0x3d1   :  { %2606 = vmatprep.subr.bf16.mxu1 %v3763_v34  ;;  %v3815_v34 = vld [vmem:[#allocation7 + $0x950] ss:$8 sps:$4 sm:$0xff]  }
 0x3d4   :  { %2607 = vmatpush1.bf16.msra.mxu1 %v3761_v41  ;;  %v3820_v41 = vld [vmem:[#allocation7 + $0x964] ss:$8 sps:$4 sm:$0xff]  }
 0x3d5   :  { %2608 = vmatprep.subr.bf16.mxu1 %v3766_v38  ;;  %v3818_v38 = vld [vmem:[#allocation7 + $0x960] ss:$8 sps:$4 sm:$0xff]  }
 0x3d8   :  { %2609 = vmatpush1.bf16.msra.mxu1 %v3764_v37  ;;  %v3823_v37 = vld [vmem:[#allocation7 + $0x974] ss:$8 sps:$4 sm:$0xff]  }
 0x3d9   :  { %2610 = vmatprep.subr.bf16.mxu1 %v3769_v40  ;;  %v3821_v40 = vld [vmem:[#allocation7 + $0x970] ss:$8 sps:$4 sm:$0xff]  }
 0x3dc   :  { %2611 = vmatpush1.bf16.msra.mxu1 %v3767_v42  ;;  %v3826_v42 = vld [vmem:[#allocation7 + $0x984] ss:$8 sps:$4 sm:$0xff]  }
 0x3dd   :  { %2612 = vmatprep.subr.bf16.mxu1 %v3772_v44  ;;  %v3824_v44 = vld [vmem:[#allocation7 + $0x980] ss:$8 sps:$4 sm:$0xff]  }
 0x3e0   :  { %2613 = vmatpush1.bf16.msra.mxu1 %v3770_v47  ;;  %v3829_v47 = vld [vmem:[#allocation7 + $0x994] ss:$8 sps:$4 sm:$0xff]  }
 0x3e1   :  { %2614 = vmatprep.subr.bf16.mxu1 %v3775_v48  ;;  %v3827_v48 = vld [vmem:[#allocation7 + $0x990] ss:$8 sps:$4 sm:$0xff]  }
 0x3e4   :  { %2615 = vmatpush1.bf16.msra.mxu1 %v3773_v32  ;;  %v3832_v32 = vld [vmem:[#allocation7 + $0x9a4] ss:$8 sps:$4 sm:$0xff]  }
 0x3e5   :  { %2616 = vmatprep.subr.bf16.mxu1 %v3778_v49  ;;  %v3830_v49 = vld [vmem:[#allocation7 + $0x9a0] ss:$8 sps:$4 sm:$0xff]  }
 0x3e8   :  { %2617 = vmatpush1.bf16.msra.mxu1 %v3776_v50  ;;  %v3835_v50 = vld [vmem:[#allocation7 + $0x9b4] ss:$8 sps:$4 sm:$0xff]  }
 0x3e9   :  { %2618 = vmatprep.subr.bf16.mxu1 %v3781_v51  ;;  %v3833_v51 = vld [vmem:[#allocation7 + $0x9b0] ss:$8 sps:$4 sm:$0xff]  }
 0x3ec   :  { %2619 = vmatpush1.bf16.msra.mxu1 %v3779_v52  ;;  %v3838_v52 = vld [vmem:[#allocation7 + $0x9c4] ss:$8 sps:$4 sm:$0xff]  }
 0x3ed   :  { %2620 = vmatprep.subr.bf16.mxu1 %v3784_v54  ;;  %v3836_v54 = vld [vmem:[#allocation7 + $0x9c0] ss:$8 sps:$4 sm:$0xff]  }
 0x3f0   :  { %2621 = vmatpush1.bf16.msra.mxu1 %v3782_v55 }
 0x3f1   :  { %2622 = vmatprep.subr.bf16.mxu1 %v3787_v56  ;;  %v3841_v56 = vld [vmem:[#allocation7 + $0x9d4] ss:$8 sps:$4 sm:$0xff]  }
 0x3f4   :  { %2623 = vmatpush1.bf16.msra.mxu1 %v3785_v57 }
 0x3f5   :  { %2624 = vmatprep.subr.bf16.mxu1 %v3790_v58  ;;  %v3839_v58 = vld [vmem:[#allocation7 + $0x9d0] ss:$8 sps:$4 sm:$0xff]  }
 0x3f8   :  { %2625 = vmatpush1.bf16.msra.mxu1 %v3788_v60 }
 0x3f9   :  { %2626 = vmatprep.subr.bf16.mxu1 %v3793_v62 }
 0x3fc   :  { %2627 = vmatpush1.bf16.msra.mxu1 %v3791_v0  ;;  %v3844_v0 = vld [vmem:[#allocation7 + $0x9e4] ss:$8 sps:$4 sm:$0xff]  }
 0x3fd   :  { %2628 = vmatprep.subr.bf16.mxu1 %v3796_v1  ;;  %v3842_v1 = vld [vmem:[#allocation7 + $0x9e0] ss:$8 sps:$4 sm:$0xff]  }
 0x400   :  { %v1392_v6 = vpop.f32.mrb[8].mxu0  ;;  %2629 = vmatpush1.bf16.msra.mxu1 %v3794_v2  ;;  %v3845_v2 = vld [vmem:[#allocation7 + $0x9f0] ss:$8 sps:$4 sm:$0xff]  }
 0x401   :  { %v1393_v33 = vadd.f32 %v1392_v6, %v1193_v3  ;;  %v1394_v8 = vpop.f32.mrb[9].mxu0  ;;  %2630 = vmatprep.subr.bf16.mxu1 %v3799_v4  ;;  %v3847_v3 = vld [vmem:[#allocation7 + $0x9f4] ss:$8 sps:$4 sm:$0xff]  }
 0x402   :  { %v1395_v9 = vadd.f32 %v1394_v8, %v1197_v5  ;;  %v1396_v10 = vpop.f32.mrb[10].mxu0 }
 0x403   :  { %v1397_v11 = vpop.f32.mrb[11].mxu0  ;;  %v1966_v13 = vpack.c.bf16 %v1393_v33, %v1393_v33 }
 0x404   :  { %v1967_v12 = vpack.c.bf16 %v1395_v9, %v1395_v9  ;;  %2631 = vmatpush1.bf16.msra.mxu1 %v3797_v7  ;;  %v3855_v9 = vld [vmem:[#allocation10] sm:$0xff] }
 0x405   :  { %v2650_v10 = vrot.slane %v3855_v9, %v4207_v15  ;;  %v2654_v11 = vrot.slane %v3855_v9, %v4174_v59 }
 0x406   :  { %2396 = vmatprep.mubr.bf16.mxu0 %v1967_v12 }
 0x407   :  { %2397 = vmatmul.mubr.bf16.vlgmr.msra.gmra.mrb[16].mxu0 %v1966_v13  ;;  %v2660_v12 = vrot.slane %v2650_v10, %v4207_v15  ;;  %v2664_v13 = vrot.slane %v2654_v11, %v4207_v15 }
 0x408   :  { %2889 = vmatpush1.bf16.msra.mxu0 %v3800_v63 }
 0x409   :  { %2890 = vmatprep.subr.bf16.mxu0 %v3805_v26 }
 0x40c   :  { %2891 = vmatpush1.bf16.msra.mxu0 %v3803_v39 }
 0x40d   :  { %2892 = vmatprep.subr.bf16.mxu0 %v3808_v27 }
 0x410   :  { %2893 = vmatpush1.bf16.msra.mxu0 %v3806_v43 }
 0x411   :  { %2894 = vmatprep.subr.bf16.mxu0 %v3811_v28 }
 0x414   :  { %2895 = vmatpush1.bf16.msra.mxu0 %v3809_v29 }
 0x415   :  { %2896 = vmatprep.subr.bf16.mxu0 %v3814_v30 }
 0x418   :  { %2897 = vmatpush1.bf16.msra.mxu0 %v3812_v31 }
 0x419   :  { %2898 = vmatprep.subr.bf16.mxu0 %v3817_v53  ;;  %v2723_v53 = vrot.slane %v4224_v61, %v4207_v15 }
 0x41c   :  { %2899 = vmatpush1.bf16.msra.mxu0 %v3815_v34  ;;  %v2938_v34 = vrot.slane %v3855_v9, %v4150_v35 }
 0x41d   :  { %2900 = vmatprep.subr.bf16.mxu0 %v3820_v41  ;;  %v2942_v41 = vrot.slane %v3855_v9, %v4200_v19  ;;  %v3315_v19 = vld [vmem:[#allocation2] ss:$0 sm:$0xff] }
 0x420   :  { %2901 = vmatpush1.bf16.msra.mxu0 %v3818_v38 }
 0x421   :  { %2902 = vmatprep.subr.bf16.mxu0 %v3823_v37 }
 0x424   :  { %2903 = vmatpush1.bf16.msra.mxu0 %v3821_v40 }
 0x425   :  { %2904 = vmatprep.subr.bf16.mxu0 %v3826_v42 }
 0x428   :  { %2905 = vmatpush1.bf16.msra.mxu0 %v3824_v44 }
 0x429   :  { %2906 = vmatprep.subr.bf16.mxu0 %v3829_v47  ;;  %v2948_v47 = vrot.slane %v2938_v34, %v4150_v35 }
 0x42c   :  { %2907 = vmatpush1.bf16.msra.mxu0 %v3827_v48 }
 0x42d   :  { %2908 = vmatprep.subr.bf16.mxu0 %v3832_v32 }
 0x430   :  { %2909 = vmatpush1.bf16.msra.mxu0 %v3830_v49  ;;  %v2952_v49 = vrot.slane %v2942_v41, %v4150_v35 }
 0x431   :  { %2910 = vmatprep.subr.bf16.mxu0 %v3835_v50 }
 0x434   :  { %2911 = vmatpush1.bf16.msra.mxu0 %v3833_v51 }
 0x435   :  { %2912 = vmatprep.subr.bf16.mxu0 %v3838_v52 }
 0x438   :  { %2913 = vmatpush1.bf16.msra.mxu0 %v3836_v54 }
 0x439   :  { %2914 = vmatprep.subr.bf16.mxu0 %v3841_v56 }
 0x43c   :  { %2915 = vmatpush1.bf16.msra.mxu0 %v3839_v58 }
 0x43d   :  { %2916 = vmatprep.subr.bf16.mxu0 %v3844_v0 }
 0x440   :  { %v1926_v17 = vpop.f32.mrb[12].mxu0  ;;  %2917 = vmatpush1.bf16.msra.mxu0 %v3842_v1 }
 0x441   :  { %v1927_v36 = vadd.f32 %v1926_v17, %v1727_v46  ;;  %v1928_v18 = vpop.f32.mrb[13].mxu0  ;;  %2918 = vmatprep.subr.bf16.mxu0 %v3847_v3  ;;  %v2645_v46 = vpop.permute.xlu1 %2644 }
 0x442   :  { %v1929_v20 = vadd.f32 %v1928_v18, %v1731_v16  ;;  %v1930_v21 = vpop.f32.mrb[14].mxu0  ;;  %v2665_v16 = vmul.f32 %v2660_v12, %v2645_v46  ;;  %v2666_v17 = vmul.f32 %v2664_v13, %v2645_v46 }
 0x443   :  { %v1931_v22 = vpop.f32.mrb[15].mxu0  ;;  %v2438_v24 = vpack.c.bf16 %v1927_v36, %v1927_v36 }
 0x444   :  { %v2439_v23 = vpack.c.bf16 %v1929_v20, %v1929_v20  ;;  %2919 = vmatpush1.bf16.msra.mxu0 %v3845_v2  ;;  %v2672_v20 = vrot.slane %v4224_v61, %v4116_v45 }
 0x446   :  { %2632 = vmatprep.mubr.bf16.mxu1 %v2439_v23  ;;  %v2676_v23 = vrot.slane %v4226_v14, %v4116_v45  ;;  %v2727_v45 = vrot.slane %v4226_v14, %v4207_v15 }
 0x447   :  { %2633 = vmatmul.mubr.bf16.vlgmr.msra.gmra.mrb[16].mxu1 %v2438_v24 }
 0x49a   :  { %v2197_v55 = vpop.f32.mrb[12].mxu1 }
 0x49b   :  { %v2199_v57 = vpop.f32.mrb[13].mxu1 }
 0x49c   :  { %v2201_v60 = vpop.f32.mrb[14].mxu1 }
 0x49d   :  { %v2202_v62 = vpop.f32.mrb[15].mxu1 }
 0x4da   :  { %v2398_v4 = vpop.f32.mrb[16].mxu0 }
 0x4db   :  { %v2399_v5 = vadd.f32 %v2398_v4, %v2197_v55  ;;  %v2400_v6 = vpop.f32.mrb[17].mxu0 }
 0x4dc   :  { %v2401_v7 = vadd.f32 %v2400_v6, %v2199_v57  ;;  %v2402_v33 = vpop.f32.mrb[18].mxu0 }
 0x4dd   :  { %v2403_v8 = vpop.f32.mrb[19].mxu0 }
 0x51a   :  { %v2634_v36 = vpop.f32.mrb[16].mxu1 }
 0x51b   :  { %v2641_v18 = vadd.f32 %v2634_v36, %v2399_v5  ;;  %v2636_v21 = vpop.f32.mrb[17].mxu1 }
 0x51c   :  { %v2642_v22 = vadd.f32 %v2636_v21, %v2401_v7  ;;  %v2638_v24 = vpop.f32.mrb[18].mxu1 }
 0x51d   :  { %v2667_v63 = vadd.f32 %v2665_v16, %v2641_v18  ;;  %v2639_v59 = vpop.f32.mrb[19].mxu1 }
 0x51e   :  { %v2668_v25 = vadd.f32 %v2666_v17, %v2642_v22 }
 0x51f   :  { %v2677_v26 = vadd.f32 %v2672_v20, %v2667_v63 }
 0x520   :  { %v2678_v39 = vadd.f32 %v2676_v23, %v2668_v25 }
 0x521   :  { %vm2679_vm9 = vcmp.ge.f32.partialorder %v2677_v26, 0.0  ;;  %v2681_v27 = vmul.f32 0.01, %v2677_v26 }
 0x522   :  { %vm2680_vm10 = vcmp.ge.f32.partialorder %v2678_v39, 0.0  ;;  %v2682_v43 = vmul.f32 0.01, %v2678_v39 }
 0x523   :  { %v2683_v28 = vsel %vm2679_vm9, %v2677_v26, %v2681_v27 }
 0x524   :  { %v2684_v29 = vsel %vm2680_vm10, %v2678_v39, %v2682_v43  ;;  %v2718_v31 = vpack.c.bf16 %v2683_v28, %v2683_v28 }
 0x525   :  { %v2719_v30 = vpack.c.bf16 %v2684_v29, %v2684_v29 }
 0x527   :  { %2920 = vmatprep.mubr.bf16.mxu0 %v2719_v30 }
 0x528   :  { %2921 = vmatmul.mubr.bf16.vlgmr.msra.gmra.mrb[20].mxu0 %v2718_v31 }
 0x5fb   :  { %v2922_v38 = vpop.f32.mrb[20].mxu0 }
 0x5fc   :  { %v2923_v37 = vadd.f32 %v2922_v38, %v2723_v53  ;;  %v2924_v40 = vpop.f32.mrb[21].mxu0 }
 0x5fd   :  { %v2925_v42 = vadd.f32 %v2924_v40, %v2727_v45  ;;  %v2926_v44 = vpop.f32.mrb[22].mxu0 }
 0x5fe   :  { %vm2929_vm11 = vcmp.ge.f32.partialorder %v2923_v37, 0.0  ;;  %v2931_v48 = vmul.f32 0.01, %v2923_v37  ;;  %v2927_v32 = vpop.f32.mrb[23].mxu0 }
 0x5ff   :  { %vm2930_vm12 = vcmp.ge.f32.partialorder %v2925_v42, 0.0  ;;  %v2932_v61 = vmul.f32 0.01, %v2925_v42 }
 0x600   :  { %v2933_v50 = vsel %vm2929_vm11, %v2923_v37, %v2931_v48 }
 0x601   :  { %v2934_v15 = vsel %vm2930_vm12, %v2925_v42, %v2932_v61  ;;  %v2953_v14 = vmul.f32 %v2948_v47, %v2933_v50 }
 0x602   :  { %v2954_v51 = vmul.f32 %v2952_v49, %v2934_v15 }
 0x604   :  { %v2955_v52 = vadd.f32 %v2954_v51, %v2953_v14 }
 0x606   :  { %2956 = vadd.xlane.f32.xlu1 %v2955_v52 }
 0x693   :  { %v2957_v54 = vpop.xlane.xlu1 %2956 }
 0x694   :  { %v2965_v55 = vadd.f32 %v3315_v19, %v2957_v54 }
 0x696   :  { %2967 = vst.msk [vmem:[%s4258_s7] sm:$0xff] %vm2966_vm13, %v2965_v55 }
 0x697   :  { %2972 = vsyncpa [#allocation4], 1 }
 0x698   :  { %2973 = vsyncpa [#allocation6], 1 }
 0x699   :  { %2974 = vsyncpa [#allocation9], 1 }

</bundles_post_ra>
